<compile_context>
chip_gen: v7x
topology: tpu7x:2x2x1
jax: 0.10.0
libtpu: 0.0.40
codegen_flags: <defaults>
</compile_context>

<pallas_src>
import jax
import jax.numpy as jnp
from jax import lax
from jax.experimental import pallas as pl
from jax.experimental.pallas import tpu as pltpu

HIDDEN = 32
INPUT_SIZE = 1
NUM_LAYERS = 2


def _lstm_fc_kernel(x_ref,       # (T, B, 1)   time-major input
                    wih0_ref,    # (1, 4H)     layer-0 input weights (transposed row)
                    b0_ref,      # (1, 4H)     layer-0 combined bias (b_ih + b_hh)
                    whh0_ref,    # (H, 4H)     layer-0 recurrent weights (transposed)
                    w1_ref,      # (2H, 4H)    layer-1 fused [W_ih1^T ; W_hh1^T]
                    b1_ref,      # (1, 4H)     layer-1 combined bias
                    wfc_ref,     # (H, 1)      fc weight (transposed)
                    bfc_ref,     # (1, 1)      fc bias
                    out_ref,     # (B, 1)      output
                    xproj_ref):  # scratch (T, B, 4H): hoisted layer-0 input proj
    T, B, _ = x_ref.shape
    H = whh0_ref.shape[0]

    # ---- preamble: hoist layer-0 input projection out of the loop ---------
    # (T,B,1) * (1,1,4H) + (1,1,4H) -> (T,B,4H); one VPU broadcast-multiply.
    xproj_ref[...] = (x_ref[...] * wih0_ref[...][None]
                      + b0_ref[...][None])

    # Hoisted weight / bias loads (live across the unrolled loop).
    whh0 = whh0_ref[...]                                   # (H, 4H)
    w1 = w1_ref[...]                                       # (2H, 4H)
    b1 = jnp.broadcast_to(b1_ref[...], (B, 4 * H))         # (B, 4H)

    def gate_update(gates, c):
        # gates: (B, 4H), PyTorch gate order [i, f, g, o].
        sg = jax.nn.sigmoid(gates)                         # single full-vreg pass
        i_g = sg[:, 0 * H:1 * H]
        f_g = sg[:, 1 * H:2 * H]
        o_g = sg[:, 3 * H:4 * H]
        g_g = jnp.tanh(gates[:, 2 * H:3 * H])
        c_new = f_g * c + i_g * g_g
        h_new = o_g * jnp.tanh(c_new)
        return h_new, c_new

    def step(t, carry):
        h0, c0, h1, c1 = carry
        # Layer 0: input projection precomputed -> 1 matmul per step.
        g0 = xproj_ref[t] + jnp.dot(h0, whh0,
                                    preferred_element_type=jnp.float32)
        h0, c0 = gate_update(g0, c0)
        # Layer 1: fused input+recurrent matmul -> 1 matmul per step.
        hh = jnp.concatenate([h0, h1], axis=1)             # (B, 2H)
        g1 = jnp.dot(hh, w1, preferred_element_type=jnp.float32) + b1
        h1, c1 = gate_update(g1, c1)
        # (inter-layer dropout p=0.2 is a no-op in eval mode)
        return h0, c0, h1, c1

    zeros = jnp.zeros((B, H), dtype=jnp.float32)
    init = (zeros, zeros, zeros, zeros)
    _, _, h1_last, _ = lax.fori_loop(0, T, step, init, unroll=True)

    # Final linear layer on the last timestep of the top layer.
    out_ref[...] = (jnp.dot(h1_last, wfc_ref[...],
                            preferred_element_type=jnp.float32)
                    + bfc_ref[...]).astype(out_ref.dtype)


@jax.jit
def passengers_rnn_forward(x, params):
    """x: (B, T, I) float32, batch_first like the PyTorch module."""
    B, T, I = x.shape
    x_tm = jnp.transpose(x, (1, 0, 2)).astype(jnp.float32)   # (T, B, 1)

    inputs = (
        x_tm,
        params["wih0_t"], params["b0"], params["whh0_t"],
        params["w1cat"], params["b1"],
        params["wfc_t"], params["bfc"],
    )

    vmem = pl.BlockSpec(memory_space=pltpu.MemorySpace.VMEM)
    out = pl.pallas_call(
        _lstm_fc_kernel,
        out_shape=jax.ShapeDtypeStruct((B, 1), jnp.float32),
        in_specs=[vmem] * len(inputs),
        out_specs=vmem,
        scratch_shapes=[pltpu.VMEM((T, B, 4 * HIDDEN), jnp.float32)],
    )(*inputs)
    return out


def init_params(key, input_size=INPUT_SIZE, hidden=HIDDEN):
    """Deterministic PyTorch-style init: U(-1/sqrt(H), 1/sqrt(H))."""
    H = hidden
    k = 1.0 / jnp.sqrt(jnp.asarray(H, jnp.float32))
    keys = jax.random.split(key, 10)

    def u(kk, shape):
        return jax.random.uniform(kk, shape, jnp.float32, -k, k)

    # PyTorch LSTM layer 0
    w_ih0 = u(keys[0], (4 * H, input_size))   # (4H, I)
    w_hh0 = u(keys[1], (4 * H, H))            # (4H, H)
    b_ih0 = u(keys[2], (4 * H,))
    b_hh0 = u(keys[3], (4 * H,))
    # PyTorch LSTM layer 1
    w_ih1 = u(keys[4], (4 * H, H))
    w_hh1 = u(keys[5], (4 * H, H))
    b_ih1 = u(keys[6], (4 * H,))
    b_hh1 = u(keys[7], (4 * H,))
    # fc: Linear(H, 1)
    w_fc = u(keys[8], (1, H))
    b_fc = u(keys[9], (1,))

    wih1_t = w_ih1.T                                     # (H, 4H)
    whh1_t = w_hh1.T                                     # (H, 4H)
    return {
        "wih0_t": w_ih0.T,                               # (I, 4H) == (1, 4H)
        "whh0_t": w_hh0.T,                               # (H, 4H)
        "b0": (b_ih0 + b_hh0).reshape(1, 4 * H),         # (1, 4H)
        "wih1_t": wih1_t,                                # (H, 4H)  (reference)
        "whh1_t": whh1_t,                                # (H, 4H)  (reference)
        "w1cat": jnp.concatenate([wih1_t, whh1_t], 0),   # (2H, 4H) fused layer-1
        "b1": (b_ih1 + b_hh1).reshape(1, 4 * H),         # (1, 4H)
        "wfc_t": w_fc.T,                                 # (H, 1)
        "bfc": b_fc.reshape(1, 1),                       # (1, 1)
    }


def _reference_forward(x, params):
    """Pure-JAX reference of the same LSTM+fc for a sanity check."""
    B, T, I = x.shape
    H = HIDDEN
    h0 = c0 = h1 = c1 = jnp.zeros((B, H), jnp.float32)

    def cell(x_in, h, c, wih_t, whh_t, b):
        g = x_in @ wih_t + h @ whh_t + b
        i = jax.nn.sigmoid(g[:, :H])
        f = jax.nn.sigmoid(g[:, H:2 * H])
        gg = jnp.tanh(g[:, 2 * H:3 * H])
        o = jax.nn.sigmoid(g[:, 3 * H:])
        c_n = f * c + i * gg
        return o * jnp.tanh(c_n), c_n

    for t in range(T):
        h0, c0 = cell(x[:, t, :], h0, c0, params["wih0_t"], params["whh0_t"], params["b0"])
        h1, c1 = cell(h0, h1, c1, params["wih1_t"], params["whh1_t"], params["b1"])
    return h1 @ params["wfc_t"] + params["bfc"]


if __name__ == "__main__":
    key = jax.random.PRNGKey(0)
    k_param, k_x = jax.random.split(key)

    B, T, I = 2, 8, INPUT_SIZE          # batch=2, seq=8, input_size=1
    params = init_params(k_param)
    x = jax.random.normal(k_x, (B, T, I), jnp.float32)

    out = passengers_rnn_forward(x, params)
    out = jax.block_until_ready(out)

    ref = _reference_forward(x, params)
    assert out.shape == (B, 1)
    assert jnp.allclose(out, ref, atol=1e-4, rtol=1e-4), (out, ref)

    print("KERNEL_OK")
</pallas_src>

<mosaic_0001>
module attributes {stable_mosaic.version = 11 : i64} {
  func.func @_lstm_fc_kernel(%arg0: memref<8x2x1xf32, #tpu.memory_space<vmem>>, %arg1: memref<1x128xf32, #tpu.memory_space<vmem>>, %arg2: memref<1x128xf32, #tpu.memory_space<vmem>>, %arg3: memref<32x128xf32, #tpu.memory_space<vmem>>, %arg4: memref<64x128xf32, #tpu.memory_space<vmem>>, %arg5: memref<1x128xf32, #tpu.memory_space<vmem>>, %arg6: memref<32x1xf32, #tpu.memory_space<vmem>>, %arg7: memref<1x1xf32, #tpu.memory_space<vmem>>, %arg8: memref<2x1xf32, #tpu.memory_space<vmem>>, %arg9: memref<8x2x128xf32, #tpu.memory_space<vmem>>) attributes {dimension_semantics = [], scalar_prefetch = 0 : i64, scratch_operands = 1 : i64, tpu.core_type = #tpu.core_type<tc>} {
    %c0 = arith.constant 0 : index
    %c0_0 = arith.constant 0 : index
    %c0_1 = arith.constant 0 : index
    %0 = vector.load %arg0[%c0, %c0_0, %c0_1] : memref<8x2x1xf32, #tpu.memory_space<vmem>>, vector<8x2x1xf32>
    %c0_2 = arith.constant 0 : index
    %c0_3 = arith.constant 0 : index
    %1 = vector.load %arg1[%c0_2, %c0_3] : memref<1x128xf32, #tpu.memory_space<vmem>>, vector<1x128xf32>
    %2 = vector.shape_cast %1 : vector<1x128xf32> to vector<1x1x128xf32>
    %3 = vector.broadcast %0 : vector<8x2x1xf32> to vector<8x2x128xf32>
    %4 = vector.broadcast %2 : vector<1x1x128xf32> to vector<8x2x128xf32>
    %5 = arith.mulf %3, %4 : vector<8x2x128xf32>
    %c0_4 = arith.constant 0 : index
    %c0_5 = arith.constant 0 : index
    %6 = vector.load %arg2[%c0_4, %c0_5] : memref<1x128xf32, #tpu.memory_space<vmem>>, vector<1x128xf32>
    %7 = vector.shape_cast %6 : vector<1x128xf32> to vector<1x1x128xf32>
    %8 = vector.broadcast %7 : vector<1x1x128xf32> to vector<8x2x128xf32>
    %9 = arith.addf %5, %8 : vector<8x2x128xf32>
    %c0_6 = arith.constant 0 : index
    %c0_7 = arith.constant 0 : index
    %c0_8 = arith.constant 0 : index
    %10 = vector.load %arg9[%c0_6, %c0_7, %c0_8] : memref<8x2x128xf32, #tpu.memory_space<vmem>>, vector<8x2x128xf32>
    tpu.vector_store %arg9[%c0_6, %c0_7, %c0_8], %9 {strides = array<i32>} : memref<8x2x128xf32, #tpu.memory_space<vmem>>, vector<8x2x128xf32>,
    %c0_9 = arith.constant 0 : index
    %c0_10 = arith.constant 0 : index
    %11 = vector.load %arg3[%c0_9, %c0_10] : memref<32x128xf32, #tpu.memory_space<vmem>>, vector<32x128xf32>
    %c0_11 = arith.constant 0 : index
    %c0_12 = arith.constant 0 : index
    %12 = vector.load %arg4[%c0_11, %c0_12] : memref<64x128xf32, #tpu.memory_space<vmem>>, vector<64x128xf32>
    %c0_13 = arith.constant 0 : index
    %c0_14 = arith.constant 0 : index
    %13 = vector.load %arg5[%c0_13, %c0_14] : memref<1x128xf32, #tpu.memory_space<vmem>>, vector<1x128xf32>
    %14 = vector.shape_cast %13 : vector<1x128xf32> to vector<1x128xf32>
    %15 = vector.broadcast %14 : vector<1x128xf32> to vector<2x128xf32>
    %cst = arith.constant 0.000000e+00 : f32
    %16 = vector.broadcast %cst : f32 to vector<2x32xf32>
    %c0_i32 = arith.constant 0 : i32
    %17 = arith.index_cast %c0_i32 : i32 to index
    %c0_15 = arith.constant 0 : index
    %c0_16 = arith.constant 0 : index
    %18 = vector.load %arg9[%17, %c0_15, %c0_16] : memref<8x2x128xf32, #tpu.memory_space<vmem>>, vector<1x2x128xf32>
    %19 = vector.shape_cast %18 : vector<1x2x128xf32> to vector<2x128xf32>
    %cst_17 = arith.constant dense<0.000000e+00> : vector<2x128xf32>
    %20 = tpu.matmul %16, %11, %cst_17 {dimension_numbers = #tpu.dot_dimension_numbers<[1], [0], [0], [1], [0, 0, 1, 1], [], []>} : vector<2x32xf32>, vector<32x128xf32>, vector<2x128xf32> -> vector<2x128xf32>
    %21 = arith.addf %19, %20 : vector<2x128xf32>
    %22 = arith.negf %21 : vector<2x128xf32>
    %23 = math.exp %22 : vector<2x128xf32>
    %cst_18 = arith.constant 1.000000e+00 : f32
    %24 = vector.broadcast %cst_18 : f32 to vector<2x128xf32>
    %25 = arith.addf %24, %23 : vector<2x128xf32>
    %26 = arith.divf %24, %25 : vector<2x128xf32>
    %27 = vector.extract_strided_slice %26 {offsets = [0, 0], sizes = [2, 32], strides = [1, 1]} : vector<2x128xf32> to vector<2x32xf32>
    %28 = vector.extract_strided_slice %26 {offsets = [0, 32], sizes = [2, 32], strides = [1, 1]} : vector<2x128xf32> to vector<2x32xf32>
    %29 = vector.extract_strided_slice %26 {offsets = [0, 96], sizes = [2, 32], strides = [1, 1]} : vector<2x128xf32> to vector<2x32xf32>
    %30 = vector.extract_strided_slice %21 {offsets = [0, 64], sizes = [2, 32], strides = [1, 1]} : vector<2x128xf32> to vector<2x32xf32>
    %31 = math.tanh %30 : vector<2x32xf32>
    %32 = arith.mulf %28, %16 : vector<2x32xf32>
    %33 = arith.mulf %27, %31 : vector<2x32xf32>
    %34 = arith.addf %32, %33 : vector<2x32xf32>
    %35 = math.tanh %34 : vector<2x32xf32>
    %36 = arith.mulf %29, %35 : vector<2x32xf32>
    %37 = tpu.concatenate %36, %16 in 1 : vector<2x32xf32>, vector<2x32xf32> -> vector<2x64xf32>
    %cst_19 = arith.constant dense<0.000000e+00> : vector<2x128xf32>
    %38 = tpu.matmul %37, %12, %cst_19 {dimension_numbers = #tpu.dot_dimension_numbers<[1], [0], [0], [1], [0, 0, 1, 1], [], []>} : vector<2x64xf32>, vector<64x128xf32>, vector<2x128xf32> -> vector<2x128xf32>
    %39 = arith.addf %38, %15 : vector<2x128xf32>
    %40 = arith.negf %39 : vector<2x128xf32>
    %41 = math.exp %40 : vector<2x128xf32>
    %cst_20 = arith.constant 1.000000e+00 : f32
    %42 = vector.broadcast %cst_20 : f32 to vector<2x128xf32>
    %43 = arith.addf %42, %41 : vector<2x128xf32>
    %44 = arith.divf %42, %43 : vector<2x128xf32>
    %45 = vector.extract_strided_slice %44 {offsets = [0, 0], sizes = [2, 32], strides = [1, 1]} : vector<2x128xf32> to vector<2x32xf32>
    %46 = vector.extract_strided_slice %44 {offsets = [0, 32], sizes = [2, 32], strides = [1, 1]} : vector<2x128xf32> to vector<2x32xf32>
    %47 = vector.extract_strided_slice %44 {offsets = [0, 96], sizes = [2, 32], strides = [1, 1]} : vector<2x128xf32> to vector<2x32xf32>
    %48 = vector.extract_strided_slice %39 {offsets = [0, 64], sizes = [2, 32], strides = [1, 1]} : vector<2x128xf32> to vector<2x32xf32>
    %49 = math.tanh %48 : vector<2x32xf32>
    %50 = arith.mulf %46, %16 : vector<2x32xf32>
    %51 = arith.mulf %45, %49 : vector<2x32xf32>
    %52 = arith.addf %50, %51 : vector<2x32xf32>
    %53 = math.tanh %52 : vector<2x32xf32>
    %54 = arith.mulf %47, %53 : vector<2x32xf32>
    %c1_i32 = arith.constant 1 : i32
    %55 = arith.index_cast %c1_i32 : i32 to index
    %c0_21 = arith.constant 0 : index
    %c0_22 = arith.constant 0 : index
    %56 = vector.load %arg9[%55, %c0_21, %c0_22] : memref<8x2x128xf32, #tpu.memory_space<vmem>>, vector<1x2x128xf32>
    %57 = vector.shape_cast %56 : vector<1x2x128xf32> to vector<2x128xf32>
    %cst_23 = arith.constant dense<0.000000e+00> : vector<2x128xf32>
    %58 = tpu.matmul %36, %11, %cst_23 {dimension_numbers = #tpu.dot_dimension_numbers<[1], [0], [0], [1], [0, 0, 1, 1], [], []>} : vector<2x32xf32>, vector<32x128xf32>, vector<2x128xf32> -> vector<2x128xf32>
    %59 = arith.addf %57, %58 : vector<2x128xf32>
    %60 = arith.negf %59 : vector<2x128xf32>
    %61 = math.exp %60 : vector<2x128xf32>
    %cst_24 = arith.constant 1.000000e+00 : f32
    %62 = vector.broadcast %cst_24 : f32 to vector<2x128xf32>
    %63 = arith.addf %62, %61 : vector<2x128xf32>
    %64 = arith.divf %62, %63 : vector<2x128xf32>
    %65 = vector.extract_strided_slice %64 {offsets = [0, 0], sizes = [2, 32], strides = [1, 1]} : vector<2x128xf32> to vector<2x32xf32>
    %66 = vector.extract_strided_slice %64 {offsets = [0, 32], sizes = [2, 32], strides = [1, 1]} : vector<2x128xf32> to vector<2x32xf32>
    %67 = vector.extract_strided_slice %64 {offsets = [0, 96], sizes = [2, 32], strides = [1, 1]} : vector<2x128xf32> to vector<2x32xf32>
    %68 = vector.extract_strided_slice %59 {offsets = [0, 64], sizes = [2, 32], strides = [1, 1]} : vector<2x128xf32> to vector<2x32xf32>
    %69 = math.tanh %68 : vector<2x32xf32>
    %70 = arith.mulf %66, %34 : vector<2x32xf32>
    %71 = arith.mulf %65, %69 : vector<2x32xf32>
    %72 = arith.addf %70, %71 : vector<2x32xf32>
    %73 = math.tanh %72 : vector<2x32xf32>
    %74 = arith.mulf %67, %73 : vector<2x32xf32>
    %75 = tpu.concatenate %74, %54 in 1 : vector<2x32xf32>, vector<2x32xf32> -> vector<2x64xf32>
    %cst_25 = arith.constant dense<0.000000e+00> : vector<2x128xf32>
    %76 = tpu.matmul %75, %12, %cst_25 {dimension_numbers = #tpu.dot_dimension_numbers<[1], [0], [0], [1], [0, 0, 1, 1], [], []>} : vector<2x64xf32>, vector<64x128xf32>, vector<2x128xf32> -> vector<2x128xf32>
    %77 = arith.addf %76, %15 : vector<2x128xf32>
    %78 = arith.negf %77 : vector<2x128xf32>
    %79 = math.exp %78 : vector<2x128xf32>
    %cst_26 = arith.constant 1.000000e+00 : f32
    %80 = vector.broadcast %cst_26 : f32 to vector<2x128xf32>
    %81 = arith.addf %80, %79 : vector<2x128xf32>
    %82 = arith.divf %80, %81 : vector<2x128xf32>
    %83 = vector.extract_strided_slice %82 {offsets = [0, 0], sizes = [2, 32], strides = [1, 1]} : vector<2x128xf32> to vector<2x32xf32>
    %84 = vector.extract_strided_slice %82 {offsets = [0, 32], sizes = [2, 32], strides = [1, 1]} : vector<2x128xf32> to vector<2x32xf32>
    %85 = vector.extract_strided_slice %82 {offsets = [0, 96], sizes = [2, 32], strides = [1, 1]} : vector<2x128xf32> to vector<2x32xf32>
    %86 = vector.extract_strided_slice %77 {offsets = [0, 64], sizes = [2, 32], strides = [1, 1]} : vector<2x128xf32> to vector<2x32xf32>
    %87 = math.tanh %86 : vector<2x32xf32>
    %88 = arith.mulf %84, %52 : vector<2x32xf32>
    %89 = arith.mulf %83, %87 : vector<2x32xf32>
    %90 = arith.addf %88, %89 : vector<2x32xf32>
    %91 = math.tanh %90 : vector<2x32xf32>
    %92 = arith.mulf %85, %91 : vector<2x32xf32>
    %c2_i32 = arith.constant 2 : i32
    %93 = arith.index_cast %c2_i32 : i32 to index
    %c0_27 = arith.constant 0 : index
    %c0_28 = arith.constant 0 : index
    %94 = vector.load %arg9[%93, %c0_27, %c0_28] : memref<8x2x128xf32, #tpu.memory_space<vmem>>, vector<1x2x128xf32>
    %95 = vector.shape_cast %94 : vector<1x2x128xf32> to vector<2x128xf32>
    %cst_29 = arith.constant dense<0.000000e+00> : vector<2x128xf32>
    %96 = tpu.matmul %74, %11, %cst_29 {dimension_numbers = #tpu.dot_dimension_numbers<[1], [0], [0], [1], [0, 0, 1, 1], [], []>} : vector<2x32xf32>, vector<32x128xf32>, vector<2x128xf32> -> vector<2x128xf32>
    %97 = arith.addf %95, %96 : vector<2x128xf32>
    %98 = arith.negf %97 : vector<2x128xf32>
    %99 = math.exp %98 : vector<2x128xf32>
    %cst_30 = arith.constant 1.000000e+00 : f32
    %100 = vector.broadcast %cst_30 : f32 to vector<2x128xf32>
    %101 = arith.addf %100, %99 : vector<2x128xf32>
    %102 = arith.divf %100, %101 : vector<2x128xf32>
    %103 = vector.extract_strided_slice %102 {offsets = [0, 0], sizes = [2, 32], strides = [1, 1]} : vector<2x128xf32> to vector<2x32xf32>
    %104 = vector.extract_strided_slice %102 {offsets = [0, 32], sizes = [2, 32], strides = [1, 1]} : vector<2x128xf32> to vector<2x32xf32>
    %105 = vector.extract_strided_slice %102 {offsets = [0, 96], sizes = [2, 32], strides = [1, 1]} : vector<2x128xf32> to vector<2x32xf32>
    %106 = vector.extract_strided_slice %97 {offsets = [0, 64], sizes = [2, 32], strides = [1, 1]} : vector<2x128xf32> to vector<2x32xf32>
    %107 = math.tanh %106 : vector<2x32xf32>
    %108 = arith.mulf %104, %72 : vector<2x32xf32>
    %109 = arith.mulf %103, %107 : vector<2x32xf32>
    %110 = arith.addf %108, %109 : vector<2x32xf32>
    %111 = math.tanh %110 : vector<2x32xf32>
    %112 = arith.mulf %105, %111 : vector<2x32xf32>
    %113 = tpu.concatenate %112, %92 in 1 : vector<2x32xf32>, vector<2x32xf32> -> vector<2x64xf32>
    %cst_31 = arith.constant dense<0.000000e+00> : vector<2x128xf32>
    %114 = tpu.matmul %113, %12, %cst_31 {dimension_numbers = #tpu.dot_dimension_numbers<[1], [0], [0], [1], [0, 0, 1, 1], [], []>} : vector<2x64xf32>, vector<64x128xf32>, vector<2x128xf32> -> vector<2x128xf32>
    %115 = arith.addf %114, %15 : vector<2x128xf32>
    %116 = arith.negf %115 : vector<2x128xf32>
    %117 = math.exp %116 : vector<2x128xf32>
    %cst_32 = arith.constant 1.000000e+00 : f32
    %118 = vector.broadcast %cst_32 : f32 to vector<2x128xf32>
    %119 = arith.addf %118, %117 : vector<2x128xf32>
    %120 = arith.divf %118, %119 : vector<2x128xf32>
    %121 = vector.extract_strided_slice %120 {offsets = [0, 0], sizes = [2, 32], strides = [1, 1]} : vector<2x128xf32> to vector<2x32xf32>
    %122 = vector.extract_strided_slice %120 {offsets = [0, 32], sizes = [2, 32], strides = [1, 1]} : vector<2x128xf32> to vector<2x32xf32>
    %123 = vector.extract_strided_slice %120 {offsets = [0, 96], sizes = [2, 32], strides = [1, 1]} : vector<2x128xf32> to vector<2x32xf32>
    %124 = vector.extract_strided_slice %115 {offsets = [0, 64], sizes = [2, 32], strides = [1, 1]} : vector<2x128xf32> to vector<2x32xf32>
    %125 = math.tanh %124 : vector<2x32xf32>
    %126 = arith.mulf %122, %90 : vector<2x32xf32>
    %127 = arith.mulf %121, %125 : vector<2x32xf32>
    %128 = arith.addf %126, %127 : vector<2x32xf32>
    %129 = math.tanh %128 : vector<2x32xf32>
    %130 = arith.mulf %123, %129 : vector<2x32xf32>
    %c3_i32 = arith.constant 3 : i32
    %131 = arith.index_cast %c3_i32 : i32 to index
    %c0_33 = arith.constant 0 : index
    %c0_34 = arith.constant 0 : index
    %132 = vector.load %arg9[%131, %c0_33, %c0_34] : memref<8x2x128xf32, #tpu.memory_space<vmem>>, vector<1x2x128xf32>
    %133 = vector.shape_cast %132 : vector<1x2x128xf32> to vector<2x128xf32>
    %cst_35 = arith.constant dense<0.000000e+00> : vector<2x128xf32>
    %134 = tpu.matmul %112, %11, %cst_35 {dimension_numbers = #tpu.dot_dimension_numbers<[1], [0], [0], [1], [0, 0, 1, 1], [], []>} : vector<2x32xf32>, vector<32x128xf32>, vector<2x128xf32> -> vector<2x128xf32>
    %135 = arith.addf %133, %134 : vector<2x128xf32>
    %136 = arith.negf %135 : vector<2x128xf32>
    %137 = math.exp %136 : vector<2x128xf32>
    %cst_36 = arith.constant 1.000000e+00 : f32
    %138 = vector.broadcast %cst_36 : f32 to vector<2x128xf32>
    %139 = arith.addf %138, %137 : vector<2x128xf32>
    %140 = arith.divf %138, %139 : vector<2x128xf32>
    %141 = vector.extract_strided_slice %140 {offsets = [0, 0], sizes = [2, 32], strides = [1, 1]} : vector<2x128xf32> to vector<2x32xf32>
    %142 = vector.extract_strided_slice %140 {offsets = [0, 32], sizes = [2, 32], strides = [1, 1]} : vector<2x128xf32> to vector<2x32xf32>
    %143 = vector.extract_strided_slice %140 {offsets = [0, 96], sizes = [2, 32], strides = [1, 1]} : vector<2x128xf32> to vector<2x32xf32>
    %144 = vector.extract_strided_slice %135 {offsets = [0, 64], sizes = [2, 32], strides = [1, 1]} : vector<2x128xf32> to vector<2x32xf32>
    %145 = math.tanh %144 : vector<2x32xf32>
    %146 = arith.mulf %142, %110 : vector<2x32xf32>
    %147 = arith.mulf %141, %145 : vector<2x32xf32>
    %148 = arith.addf %146, %147 : vector<2x32xf32>
    %149 = math.tanh %148 : vector<2x32xf32>
    %150 = arith.mulf %143, %149 : vector<2x32xf32>
    %151 = tpu.concatenate %150, %130 in 1 : vector<2x32xf32>, vector<2x32xf32> -> vector<2x64xf32>
    %cst_37 = arith.constant dense<0.000000e+00> : vector<2x128xf32>
    %152 = tpu.matmul %151, %12, %cst_37 {dimension_numbers = #tpu.dot_dimension_numbers<[1], [0], [0], [1], [0, 0, 1, 1], [], []>} : vector<2x64xf32>, vector<64x128xf32>, vector<2x128xf32> -> vector<2x128xf32>
    %153 = arith.addf %152, %15 : vector<2x128xf32>
    %154 = arith.negf %153 : vector<2x128xf32>
    %155 = math.exp %154 : vector<2x128xf32>
    %cst_38 = arith.constant 1.000000e+00 : f32
    %156 = vector.broadcast %cst_38 : f32 to vector<2x128xf32>
    %157 = arith.addf %156, %155 : vector<2x128xf32>
    %158 = arith.divf %156, %157 : vector<2x128xf32>
    %159 = vector.extract_strided_slice %158 {offsets = [0, 0], sizes = [2, 32], strides = [1, 1]} : vector<2x128xf32> to vector<2x32xf32>
    %160 = vector.extract_strided_slice %158 {offsets = [0, 32], sizes = [2, 32], strides = [1, 1]} : vector<2x128xf32> to vector<2x32xf32>
    %161 = vector.extract_strided_slice %158 {offsets = [0, 96], sizes = [2, 32], strides = [1, 1]} : vector<2x128xf32> to vector<2x32xf32>
    %162 = vector.extract_strided_slice %153 {offsets = [0, 64], sizes = [2, 32], strides = [1, 1]} : vector<2x128xf32> to vector<2x32xf32>
    %163 = math.tanh %162 : vector<2x32xf32>
    %164 = arith.mulf %160, %128 : vector<2x32xf32>
    %165 = arith.mulf %159, %163 : vector<2x32xf32>
    %166 = arith.addf %164, %165 : vector<2x32xf32>
    %167 = math.tanh %166 : vector<2x32xf32>
    %168 = arith.mulf %161, %167 : vector<2x32xf32>
    %c4_i32 = arith.constant 4 : i32
    %169 = arith.index_cast %c4_i32 : i32 to index
    %c0_39 = arith.constant 0 : index
    %c0_40 = arith.constant 0 : index
    %170 = vector.load %arg9[%169, %c0_39, %c0_40] : memref<8x2x128xf32, #tpu.memory_space<vmem>>, vector<1x2x128xf32>
    %171 = vector.shape_cast %170 : vector<1x2x128xf32> to vector<2x128xf32>
    %cst_41 = arith.constant dense<0.000000e+00> : vector<2x128xf32>
    %172 = tpu.matmul %150, %11, %cst_41 {dimension_numbers = #tpu.dot_dimension_numbers<[1], [0], [0], [1], [0, 0, 1, 1], [], []>} : vector<2x32xf32>, vector<32x128xf32>, vector<2x128xf32> -> vector<2x128xf32>
    %173 = arith.addf %171, %172 : vector<2x128xf32>
    %174 = arith.negf %173 : vector<2x128xf32>
    %175 = math.exp %174 : vector<2x128xf32>
    %cst_42 = arith.constant 1.000000e+00 : f32
    %176 = vector.broadcast %cst_42 : f32 to vector<2x128xf32>
    %177 = arith.addf %176, %175 : vector<2x128xf32>
    %178 = arith.divf %176, %177 : vector<2x128xf32>
    %179 = vector.extract_strided_slice %178 {offsets = [0, 0], sizes = [2, 32], strides = [1, 1]} : vector<2x128xf32> to vector<2x32xf32>
    %180 = vector.extract_strided_slice %178 {offsets = [0, 32], sizes = [2, 32], strides = [1, 1]} : vector<2x128xf32> to vector<2x32xf32>
    %181 = vector.extract_strided_slice %178 {offsets = [0, 96], sizes = [2, 32], strides = [1, 1]} : vector<2x128xf32> to vector<2x32xf32>
    %182 = vector.extract_strided_slice %173 {offsets = [0, 64], sizes = [2, 32], strides = [1, 1]} : vector<2x128xf32> to vector<2x32xf32>
    %183 = math.tanh %182 : vector<2x32xf32>
    %184 = arith.mulf %180, %148 : vector<2x32xf32>
    %185 = arith.mulf %179, %183 : vector<2x32xf32>
    %186 = arith.addf %184, %185 : vector<2x32xf32>
    %187 = math.tanh %186 : vector<2x32xf32>
    %188 = arith.mulf %181, %187 : vector<2x32xf32>
    %189 = tpu.concatenate %188, %168 in 1 : vector<2x32xf32>, vector<2x32xf32> -> vector<2x64xf32>
    %cst_43 = arith.constant dense<0.000000e+00> : vector<2x128xf32>
    %190 = tpu.matmul %189, %12, %cst_43 {dimension_numbers = #tpu.dot_dimension_numbers<[1], [0], [0], [1], [0, 0, 1, 1], [], []>} : vector<2x64xf32>, vector<64x128xf32>, vector<2x128xf32> -> vector<2x128xf32>
    %191 = arith.addf %190, %15 : vector<2x128xf32>
    %192 = arith.negf %191 : vector<2x128xf32>
    %193 = math.exp %192 : vector<2x128xf32>
    %cst_44 = arith.constant 1.000000e+00 : f32
    %194 = vector.broadcast %cst_44 : f32 to vector<2x128xf32>
    %195 = arith.addf %194, %193 : vector<2x128xf32>
    %196 = arith.divf %194, %195 : vector<2x128xf32>
    %197 = vector.extract_strided_slice %196 {offsets = [0, 0], sizes = [2, 32], strides = [1, 1]} : vector<2x128xf32> to vector<2x32xf32>
    %198 = vector.extract_strided_slice %196 {offsets = [0, 32], sizes = [2, 32], strides = [1, 1]} : vector<2x128xf32> to vector<2x32xf32>
    %199 = vector.extract_strided_slice %196 {offsets = [0, 96], sizes = [2, 32], strides = [1, 1]} : vector<2x128xf32> to vector<2x32xf32>
    %200 = vector.extract_strided_slice %191 {offsets = [0, 64], sizes = [2, 32], strides = [1, 1]} : vector<2x128xf32> to vector<2x32xf32>
    %201 = math.tanh %200 : vector<2x32xf32>
    %202 = arith.mulf %198, %166 : vector<2x32xf32>
    %203 = arith.mulf %197, %201 : vector<2x32xf32>
    %204 = arith.addf %202, %203 : vector<2x32xf32>
    %205 = math.tanh %204 : vector<2x32xf32>
    %206 = arith.mulf %199, %205 : vector<2x32xf32>
    %c5_i32 = arith.constant 5 : i32
    %207 = arith.index_cast %c5_i32 : i32 to index
    %c0_45 = arith.constant 0 : index
    %c0_46 = arith.constant 0 : index
    %208 = vector.load %arg9[%207, %c0_45, %c0_46] : memref<8x2x128xf32, #tpu.memory_space<vmem>>, vector<1x2x128xf32>
    %209 = vector.shape_cast %208 : vector<1x2x128xf32> to vector<2x128xf32>
    %cst_47 = arith.constant dense<0.000000e+00> : vector<2x128xf32>
    %210 = tpu.matmul %188, %11, %cst_47 {dimension_numbers = #tpu.dot_dimension_numbers<[1], [0], [0], [1], [0, 0, 1, 1], [], []>} : vector<2x32xf32>, vector<32x128xf32>, vector<2x128xf32> -> vector<2x128xf32>
    %211 = arith.addf %209, %210 : vector<2x128xf32>
    %212 = arith.negf %211 : vector<2x128xf32>
    %213 = math.exp %212 : vector<2x128xf32>
    %cst_48 = arith.constant 1.000000e+00 : f32
    %214 = vector.broadcast %cst_48 : f32 to vector<2x128xf32>
    %215 = arith.addf %214, %213 : vector<2x128xf32>
    %216 = arith.divf %214, %215 : vector<2x128xf32>
    %217 = vector.extract_strided_slice %216 {offsets = [0, 0], sizes = [2, 32], strides = [1, 1]} : vector<2x128xf32> to vector<2x32xf32>
    %218 = vector.extract_strided_slice %216 {offsets = [0, 32], sizes = [2, 32], strides = [1, 1]} : vector<2x128xf32> to vector<2x32xf32>
    %219 = vector.extract_strided_slice %216 {offsets = [0, 96], sizes = [2, 32], strides = [1, 1]} : vector<2x128xf32> to vector<2x32xf32>
    %220 = vector.extract_strided_slice %211 {offsets = [0, 64], sizes = [2, 32], strides = [1, 1]} : vector<2x128xf32> to vector<2x32xf32>
    %221 = math.tanh %220 : vector<2x32xf32>
    %222 = arith.mulf %218, %186 : vector<2x32xf32>
    %223 = arith.mulf %217, %221 : vector<2x32xf32>
    %224 = arith.addf %222, %223 : vector<2x32xf32>
    %225 = math.tanh %224 : vector<2x32xf32>
    %226 = arith.mulf %219, %225 : vector<2x32xf32>
    %227 = tpu.concatenate %226, %206 in 1 : vector<2x32xf32>, vector<2x32xf32> -> vector<2x64xf32>
    %cst_49 = arith.constant dense<0.000000e+00> : vector<2x128xf32>
    %228 = tpu.matmul %227, %12, %cst_49 {dimension_numbers = #tpu.dot_dimension_numbers<[1], [0], [0], [1], [0, 0, 1, 1], [], []>} : vector<2x64xf32>, vector<64x128xf32>, vector<2x128xf32> -> vector<2x128xf32>
    %229 = arith.addf %228, %15 : vector<2x128xf32>
    %230 = arith.negf %229 : vector<2x128xf32>
    %231 = math.exp %230 : vector<2x128xf32>
    %cst_50 = arith.constant 1.000000e+00 : f32
    %232 = vector.broadcast %cst_50 : f32 to vector<2x128xf32>
    %233 = arith.addf %232, %231 : vector<2x128xf32>
    %234 = arith.divf %232, %233 : vector<2x128xf32>
    %235 = vector.extract_strided_slice %234 {offsets = [0, 0], sizes = [2, 32], strides = [1, 1]} : vector<2x128xf32> to vector<2x32xf32>
    %236 = vector.extract_strided_slice %234 {offsets = [0, 32], sizes = [2, 32], strides = [1, 1]} : vector<2x128xf32> to vector<2x32xf32>
    %237 = vector.extract_strided_slice %234 {offsets = [0, 96], sizes = [2, 32], strides = [1, 1]} : vector<2x128xf32> to vector<2x32xf32>
    %238 = vector.extract_strided_slice %229 {offsets = [0, 64], sizes = [2, 32], strides = [1, 1]} : vector<2x128xf32> to vector<2x32xf32>
    %239 = math.tanh %238 : vector<2x32xf32>
    %240 = arith.mulf %236, %204 : vector<2x32xf32>
    %241 = arith.mulf %235, %239 : vector<2x32xf32>
    %242 = arith.addf %240, %241 : vector<2x32xf32>
    %243 = math.tanh %242 : vector<2x32xf32>
    %244 = arith.mulf %237, %243 : vector<2x32xf32>
    %c6_i32 = arith.constant 6 : i32
    %245 = arith.index_cast %c6_i32 : i32 to index
    %c0_51 = arith.constant 0 : index
    %c0_52 = arith.constant 0 : index
    %246 = vector.load %arg9[%245, %c0_51, %c0_52] : memref<8x2x128xf32, #tpu.memory_space<vmem>>, vector<1x2x128xf32>
    %247 = vector.shape_cast %246 : vector<1x2x128xf32> to vector<2x128xf32>
    %cst_53 = arith.constant dense<0.000000e+00> : vector<2x128xf32>
    %248 = tpu.matmul %226, %11, %cst_53 {dimension_numbers = #tpu.dot_dimension_numbers<[1], [0], [0], [1], [0, 0, 1, 1], [], []>} : vector<2x32xf32>, vector<32x128xf32>, vector<2x128xf32> -> vector<2x128xf32>
    %249 = arith.addf %247, %248 : vector<2x128xf32>
    %250 = arith.negf %249 : vector<2x128xf32>
    %251 = math.exp %250 : vector<2x128xf32>
    %cst_54 = arith.constant 1.000000e+00 : f32
    %252 = vector.broadcast %cst_54 : f32 to vector<2x128xf32>
    %253 = arith.addf %252, %251 : vector<2x128xf32>
    %254 = arith.divf %252, %253 : vector<2x128xf32>
    %255 = vector.extract_strided_slice %254 {offsets = [0, 0], sizes = [2, 32], strides = [1, 1]} : vector<2x128xf32> to vector<2x32xf32>
    %256 = vector.extract_strided_slice %254 {offsets = [0, 32], sizes = [2, 32], strides = [1, 1]} : vector<2x128xf32> to vector<2x32xf32>
    %257 = vector.extract_strided_slice %254 {offsets = [0, 96], sizes = [2, 32], strides = [1, 1]} : vector<2x128xf32> to vector<2x32xf32>
    %258 = vector.extract_strided_slice %249 {offsets = [0, 64], sizes = [2, 32], strides = [1, 1]} : vector<2x128xf32> to vector<2x32xf32>
    %259 = math.tanh %258 : vector<2x32xf32>
    %260 = arith.mulf %256, %224 : vector<2x32xf32>
    %261 = arith.mulf %255, %259 : vector<2x32xf32>
    %262 = arith.addf %260, %261 : vector<2x32xf32>
    %263 = math.tanh %262 : vector<2x32xf32>
    %264 = arith.mulf %257, %263 : vector<2x32xf32>
    %265 = tpu.concatenate %264, %244 in 1 : vector<2x32xf32>, vector<2x32xf32> -> vector<2x64xf32>
    %cst_55 = arith.constant dense<0.000000e+00> : vector<2x128xf32>
    %266 = tpu.matmul %265, %12, %cst_55 {dimension_numbers = #tpu.dot_dimension_numbers<[1], [0], [0], [1], [0, 0, 1, 1], [], []>} : vector<2x64xf32>, vector<64x128xf32>, vector<2x128xf32> -> vector<2x128xf32>
    %267 = arith.addf %266, %15 : vector<2x128xf32>
    %268 = arith.negf %267 : vector<2x128xf32>
    %269 = math.exp %268 : vector<2x128xf32>
    %cst_56 = arith.constant 1.000000e+00 : f32
    %270 = vector.broadcast %cst_56 : f32 to vector<2x128xf32>
    %271 = arith.addf %270, %269 : vector<2x128xf32>
    %272 = arith.divf %270, %271 : vector<2x128xf32>
    %273 = vector.extract_strided_slice %272 {offsets = [0, 0], sizes = [2, 32], strides = [1, 1]} : vector<2x128xf32> to vector<2x32xf32>
    %274 = vector.extract_strided_slice %272 {offsets = [0, 32], sizes = [2, 32], strides = [1, 1]} : vector<2x128xf32> to vector<2x32xf32>
    %275 = vector.extract_strided_slice %272 {offsets = [0, 96], sizes = [2, 32], strides = [1, 1]} : vector<2x128xf32> to vector<2x32xf32>
    %276 = vector.extract_strided_slice %267 {offsets = [0, 64], sizes = [2, 32], strides = [1, 1]} : vector<2x128xf32> to vector<2x32xf32>
    %277 = math.tanh %276 : vector<2x32xf32>
    %278 = arith.mulf %274, %242 : vector<2x32xf32>
    %279 = arith.mulf %273, %277 : vector<2x32xf32>
    %280 = arith.addf %278, %279 : vector<2x32xf32>
    %281 = math.tanh %280 : vector<2x32xf32>
    %282 = arith.mulf %275, %281 : vector<2x32xf32>
    %c7_i32 = arith.constant 7 : i32
    %283 = arith.index_cast %c7_i32 : i32 to index
    %c0_57 = arith.constant 0 : index
    %c0_58 = arith.constant 0 : index
    %284 = vector.load %arg9[%283, %c0_57, %c0_58] : memref<8x2x128xf32, #tpu.memory_space<vmem>>, vector<1x2x128xf32>
    %285 = vector.shape_cast %284 : vector<1x2x128xf32> to vector<2x128xf32>
    %cst_59 = arith.constant dense<0.000000e+00> : vector<2x128xf32>
    %286 = tpu.matmul %264, %11, %cst_59 {dimension_numbers = #tpu.dot_dimension_numbers<[1], [0], [0], [1], [0, 0, 1, 1], [], []>} : vector<2x32xf32>, vector<32x128xf32>, vector<2x128xf32> -> vector<2x128xf32>
    %287 = arith.addf %285, %286 : vector<2x128xf32>
    %288 = arith.negf %287 : vector<2x128xf32>
    %289 = math.exp %288 : vector<2x128xf32>
    %cst_60 = arith.constant 1.000000e+00 : f32
    %290 = vector.broadcast %cst_60 : f32 to vector<2x128xf32>
    %291 = arith.addf %290, %289 : vector<2x128xf32>
    %292 = arith.divf %290, %291 : vector<2x128xf32>
    %293 = vector.extract_strided_slice %292 {offsets = [0, 0], sizes = [2, 32], strides = [1, 1]} : vector<2x128xf32> to vector<2x32xf32>
    %294 = vector.extract_strided_slice %292 {offsets = [0, 32], sizes = [2, 32], strides = [1, 1]} : vector<2x128xf32> to vector<2x32xf32>
    %295 = vector.extract_strided_slice %292 {offsets = [0, 96], sizes = [2, 32], strides = [1, 1]} : vector<2x128xf32> to vector<2x32xf32>
    %296 = vector.extract_strided_slice %287 {offsets = [0, 64], sizes = [2, 32], strides = [1, 1]} : vector<2x128xf32> to vector<2x32xf32>
    %297 = math.tanh %296 : vector<2x32xf32>
    %298 = arith.mulf %294, %262 : vector<2x32xf32>
    %299 = arith.mulf %293, %297 : vector<2x32xf32>
    %300 = arith.addf %298, %299 : vector<2x32xf32>
    %301 = math.tanh %300 : vector<2x32xf32>
    %302 = arith.mulf %295, %301 : vector<2x32xf32>
    %303 = tpu.concatenate %302, %282 in 1 : vector<2x32xf32>, vector<2x32xf32> -> vector<2x64xf32>
    %cst_61 = arith.constant dense<0.000000e+00> : vector<2x128xf32>
    %304 = tpu.matmul %303, %12, %cst_61 {dimension_numbers = #tpu.dot_dimension_numbers<[1], [0], [0], [1], [0, 0, 1, 1], [], []>} : vector<2x64xf32>, vector<64x128xf32>, vector<2x128xf32> -> vector<2x128xf32>
    %305 = arith.addf %304, %15 : vector<2x128xf32>
    %306 = arith.negf %305 : vector<2x128xf32>
    %307 = math.exp %306 : vector<2x128xf32>
    %cst_62 = arith.constant 1.000000e+00 : f32
    %308 = vector.broadcast %cst_62 : f32 to vector<2x128xf32>
    %309 = arith.addf %308, %307 : vector<2x128xf32>
    %310 = arith.divf %308, %309 : vector<2x128xf32>
    %311 = vector.extract_strided_slice %310 {offsets = [0, 0], sizes = [2, 32], strides = [1, 1]} : vector<2x128xf32> to vector<2x32xf32>
    %312 = vector.extract_strided_slice %310 {offsets = [0, 32], sizes = [2, 32], strides = [1, 1]} : vector<2x128xf32> to vector<2x32xf32>
    %313 = vector.extract_strided_slice %310 {offsets = [0, 96], sizes = [2, 32], strides = [1, 1]} : vector<2x128xf32> to vector<2x32xf32>
    %314 = vector.extract_strided_slice %305 {offsets = [0, 64], sizes = [2, 32], strides = [1, 1]} : vector<2x128xf32> to vector<2x32xf32>
    %315 = math.tanh %314 : vector<2x32xf32>
    %316 = arith.mulf %312, %280 : vector<2x32xf32>
    %317 = arith.mulf %311, %315 : vector<2x32xf32>
    %318 = arith.addf %316, %317 : vector<2x32xf32>
    %319 = math.tanh %318 : vector<2x32xf32>
    %320 = arith.mulf %313, %319 : vector<2x32xf32>
    %c8_i32 = arith.constant 8 : i32
    %c0_63 = arith.constant 0 : index
    %c0_64 = arith.constant 0 : index
    %321 = vector.load %arg6[%c0_63, %c0_64] : memref<32x1xf32, #tpu.memory_space<vmem>>, vector<32x1xf32>
    %cst_65 = arith.constant dense<0.000000e+00> : vector<2x1xf32>
    %322 = tpu.matmul %320, %321, %cst_65 {dimension_numbers = #tpu.dot_dimension_numbers<[1], [0], [0], [1], [0, 0, 1, 1], [], []>} : vector<2x32xf32>, vector<32x1xf32>, vector<2x1xf32> -> vector<2x1xf32>
    %c0_66 = arith.constant 0 : index
    %c0_67 = arith.constant 0 : index
    %323 = vector.load %arg7[%c0_66, %c0_67] : memref<1x1xf32, #tpu.memory_space<vmem>>, vector<1x1xf32>
    %324 = vector.broadcast %323 : vector<1x1xf32> to vector<2x1xf32>
    %325 = arith.addf %322, %324 : vector<2x1xf32>
    %c0_68 = arith.constant 0 : index
    %c0_69 = arith.constant 0 : index
    %326 = vector.load %arg8[%c0_68, %c0_69] : memref<2x1xf32, #tpu.memory_space<vmem>>, vector<2x1xf32>
    tpu.vector_store %arg8[%c0_68, %c0_69], %325 {strides = array<i32>} : memref<2x1xf32, #tpu.memory_space<vmem>>, vector<2x1xf32>,
    return
  }
}

</mosaic_0001>

<bundles_post_ra>
// kernel: passengers_rnn_forward.1
= control target key start
LH: loop header
LB: loop body
LE: loop exit
PB: predicated region body
PF: predicated region fallthrough
CT: control target
= control target key end

     0   :  { %s3060_s0 = inlined_call_operand.vmem [shape: f32[8,2,1], index: 0, kind: input, shape index: {}]   ;;  %s3061_s1 = inlined_call_operand.vmem [shape: f32[1,128], index: 1, kind: input, shape index: {}]   ;;  %s3062_s2 = inlined_call_operand.vmem [shape: f32[1,128], index: 2, kind: input, shape index: {}]   ;;  %s3063_s3 = inlined_call_operand.hbm [shape: f32[32,128], index: 3, kind: input, shape index: {}]   ;;  %s3064_s4 = inlined_call_operand.vmem [shape: f32[64,128], index: 4, kind: input, shape index: {}]   ;;  %s3065_s5 = inlined_call_operand.vmem [shape: f32[1,128], index: 5, kind: input, shape index: {}]   ;;  %s3066_s6 = inlined_call_operand.vmem [shape: f32[32,1], index: 6, kind: input, shape index: {}]   ;;  %s3067_s7 = inlined_call_operand.<no memory space> [shape: f32[1,1], index: 7, kind: input, shape index: {}]   ;;  %s3068_s8 = inlined_call_operand.vmem [shape: f32[2,1], index: 8, kind: output, shape index: {}]  }
   0x1   :  { %v13_v0 = vstv %s3067_s7 }
   0x2   :  { %14 = vst [vmem:[#allocation3] sm:$0x1] %v13_v0 }
   0x3   :  { %15 = vsyncpa [#allocation5], 0  ;;  %s2600_s29 = smov [#allocation4]   ;;  %s2576_s11 = scalar_lea.hbm %s3063_s3, 512 }
   0x4   :  { %s27_s30 = sshll.u32 %s2600_s29, 4  ;;  %p2577_p0 = scmp.ne.s32.totalorder %s3063_s3, %s2576_s11  ;;  %s28_s30 = int_to_ptr.vmem [resolvable:$true] %s27_s30 }
   0x5   :  { %p2580_p1 = scmp.lt.u32.totalorder %s2576_s11, %s3063_s3 }
   0x7   :  { %p2582_p2 = pnand %p2580_p1, %p2577_p0 }
   0x9   :  { %2585 = shalt.err (!%p2582_p2)
}
   0xa   :  { %s2586_s7 = scalar_lea.vmem %s28_s30, 512  ;;  %p2591_p4 = scmp.lt.s32.totalorder %s28_s30, %s28_s30 }
   0xb   :  { %p2587_p3 = scmp.ne.s32.totalorder %s28_s30, %s2586_s7  ;;  %p2592_p5 = scmp.lt.s32.totalorder %s2586_s7, %s2586_s7 }
   0xd   :  { %p2593_p6 = por %p2592_p5, %p2591_p4 }
   0xf   :  { %p2594_p7 = pnand %p2593_p6, %p2587_p3 }
  0x11   :  { %2597 = shalt.err (!%p2594_p7)
}
  0x12   :  { %s2601_s16 = smov 128   ;;  %s2602_s17 = smov 8  }
  0x13   :  { %33 = dma.hbm_to_vmem [thread:$0]  %s3063_s3, 512, %s28_s30, [#allocation5], %s2601_s16, %s2601_s16, %s2602_s17  }
  0x14   :  { %2598 = dma.done.wait [#allocation5], 512  }
  0x15   :  { %2599 = vsyncadd [#allocation5], 4294966784  ;;  %v2603_v1 = vmov 0.0|0.0   ;;  %vm2604_vm0 = vmmov 0   ;;  %v2605_v2 = vmov 0.0   ;;  %v2606_v3 = vmov 0  }
  0x16   :  { %2285 = vmatprep.subr.bf16.mxu0 %v2603_v1  ;;  %2042 = vmatprep.mubr.msk.f32.mxu0 %vm2604_vm0, %v2605_v2  ;;  %v131_v4 = vld [vmem:[#allocation4] sm:$0xff]  ;;  %v132_v5 = vld [vmem:[#allocation4 + $0x8] sm:$0xff]  ;;  %v133_v6 = vld [vmem:[#allocation4 + $0x10] sm:$0xff]  ;;  %s2607_s25 = smov 64   ;;  %s2608_s26 = smov 32   ;;  %vm151_vm1 = vcmask 261120  }
  0x17   :  { %2444 = vset.pattern.permute.xlu0 %v2606_v3  ;;  %2291 = vmatprep.subr.bf16.mxu1 %v2603_v1  ;;  %v2675_v7 = vpack.c.bf16 %v132_v5, %v131_v4  ;;  %v134_v8 = vld [vmem:[#allocation4 + $0x18] sm:$0xff]  ;;  %v45_v9 = vld [vmem:[%s3060_s0] sm:$0x3]  ;;  %v138_v34 = vld [vmem:[%s3064_s4 + $0x18] sm:$0xff]  ;;  %vm255_vm2 = vcmask 523264   ;;  %vm1874_vm3 = vcmask 1024  }
  0x18   :  { %2061 = vmatprep.mubr.msk.f32.mxu1 %vm2604_vm0, %v2605_v2  ;;  %2445 = vset.pattern.permute.xlu1 %v2606_v3  ;;  %v2681_v10 = vpack.c.bf16 %v134_v8, %v133_v6  ;;  %v2696_v11 = vld [vmem:[%s3061_s1] ss:$0 sm:$0xff]  ;;  %v136_v31 = vld [vmem:[%s3064_s4 + $0x8] sm:$0xff]  ;;  %v137_v32 = vld [vmem:[%s3064_s4 + $0x10] sm:$0xff] }
  0x19   :  { %56 = vperm.xlu0 %2444, %v45_v9   ;;  %2287 = vmatpush3.bf16.msra.mxu0 %v2675_v7  ;;  %v2701_v12 = vld [vmem:[%s3062_s2] ss:$0 sm:$0xff]  ;;  %v2725_v35 = vpack.c.bf16 %v138_v34, %v137_v32  ;;  %v140_v37 = vld [vmem:[%s3064_s4 + $0x28] sm:$0xff]  ;;  %v141_v39 = vld [vmem:[%s3064_s4 + $0x30] sm:$0xff] }
  0x1a   :  { %2288 = vmatprep.subr.bf16.mxu0 %v2603_v1  ;;  %v135_v30 = vld [vmem:[%s3064_s4] sm:$0xff]  ;;  %v142_v40 = vld [vmem:[%s3064_s4 + $0x38] sm:$0xff] }
  0x1b   :  { %v2719_v33 = vpack.c.bf16 %v136_v31, %v135_v30  ;;  %v139_v36 = vld [vmem:[%s3064_s4 + $0x20] sm:$0xff]  ;;  %v2746_v42 = vpack.c.bf16 %v142_v40, %v141_v39 }
  0x1c   :  { %v2735_v38 = vpack.c.bf16 %v140_v37, %v139_v36  ;;  %v46_v43 = vld [vmem:[%s3060_s0 + $0x2] sm:$0x3]  ;;  %v2779_v52 = vld [vmem:[%s3065_s5] ss:$0 sm:$0xff] }
  0x1d   :  { %2290 = vmatpush3.bf16.msra.mxu0 %v2681_v10  ;;  %2293 = vmatpush3.bf16.msra.mxu1 %v2719_v33 }
  0x1e   :  { %2303 = vmatprep.subr.bf16.mxu0 %v2603_v1  ;;  %2294 = vmatprep.subr.bf16.mxu1 %v2603_v1 }
  0x20   :  { %2043 = vmatmul.mubr.f32.vlgmr.msra.gmra.mrb[0].mxu0 %v2605_v2 }
  0x21   :  { %2305 = vmatpush3.bf16.msra.mxu0 %v2675_v7  ;;  %2072 = vmatprep.mubr.msk.f32.mxu0 %vm2604_vm0, %v2605_v2 }
  0x22   :  { %2306 = vmatprep.subr.bf16.mxu0 %v2603_v1  ;;  %2296 = vmatpush3.bf16.msra.mxu1 %v2725_v35 }
  0x23   :  { %2297 = vmatprep.subr.bf16.mxu1 %v2603_v1 }
  0x25   :  { %2308 = vmatpush3.bf16.msra.mxu0 %v2681_v10 }
  0x26   :  { %2309 = vmatprep.subr.bf16.mxu0 %v2603_v1  ;;  %2299 = vmatpush3.bf16.msra.mxu1 %v2735_v38 }
  0x27   :  { %2300 = vmatprep.subr.bf16.mxu1 %v2603_v1 }
  0x2a   :  { %2302 = vmatpush3.bf16.msra.mxu1 %v2746_v42 }
  0x2b   :  { %2321 = vmatprep.subr.bf16.mxu1 %v2603_v1 }
  0x98   :  { %v57_v13 = vpop.permute.xlu0 %56 }
  0x99   :  { %v100_v14 = vmul.f32 %v2696_v11, %v57_v13 }
  0x9b   :  { %v115_v15 = vadd.f32 %v2701_v12, %v100_v14 }
  0x9d   :  { %123 = vst [vmem:[#allocation2] sm:$0x3] %v115_v15 }
  0xa4   :  { %v150_v16 = vld [vmem:[#allocation2] sm:$0x3] }
  0xf3   :  { %v221_v17 = vpop.f32.mrb[0].mxu0 }
  0xf4   :  { %v225_v18 = vadd.f32 %v221_v17, %v150_v16  ;;  %v2044_v19 = vpop.f32.mrb[1].mxu0 }
  0xf6   :  { %2446 = vtanh.f32 %v225_v18  ;;  %v1884_v21 = vmul.f32 -1.442695, %v225_v18 }
  0xf8   :  { %2448 = vpow2.f32 %v1884_v21 }
 0x100   :  { %v2447_v20 = vpop.eup %2446 }
 0x101   :  { %235 = vrot.lane.b32.xlu0 %v2447_v20, %s2607_s25 }
 0x102   :  { %v2449_v22 = vpop.eup %2448 }
 0x103   :  { %v229_v23 = vadd.f32 1.0, %v2449_v22 }
 0x105   :  { %2450 = vrcp.f32 %v229_v23 }
 0x10f   :  { %v2451_v24 = vpop.eup %2450 }
 0x110   :  { %v233_v27 = vmul.f32 0.0, %v2451_v24 }
 0x173   :  { %v236_v25 = vpop.permute.xlu0 %235 }
 0x174   :  { %v238_v26 = vmul.f32 %v2451_v24, %v236_v25 }
 0x176   :  { %240 = vrot.lane.b32.xlu1 %v238_v26, %s2608_s26 }
 0x1e8   :  { %v241_v28 = vpop.permute.xlu1 %240 }
 0x1e9   :  { %v2707_v29 = vadd.f32 %v241_v28, %v233_v27  ;;  %v47_v27 = vld [vmem:[%s3060_s0 + $0x4] sm:$0x3] }
 0x1eb   :  { %2452 = vtanh.f32 %v2707_v29 }
 0x1f5   :  { %v2453_v41 = vpop.eup %2452 }
 0x1f6   :  { %246 = vrot.lane.b32.xlu1 %v2453_v41, %s2607_s25 }
 0x1fa   :  { %61 = vperm.xlu1 %2445, %v46_v43  }
 0x268   :  { %v247_v44 = vpop.permute.xlu1 %246 }
 0x269   :  { %v249_v45 = vmul.f32 %v2451_v24, %v247_v44 }
 0x26b   :  { %251 = vrot.lane.b32.xlu0 %v249_v45, %s2608_s26 }
 0x279   :  { %v62_v48 = vpop.permute.xlu1 %61 }
 0x27a   :  { %v101_v49 = vmul.f32 %v2696_v11, %v62_v48 }
 0x27c   :  { %v116_v50 = vadd.f32 %v2701_v12, %v101_v49 }
 0x27e   :  { %124 = vst [vmem:[#allocation2 + $0x2] sm:$0x3] %v116_v50 }
 0x285   :  { %v354_v51 = vld [vmem:[#allocation2 + $0x2] sm:$0x3] }
 0x2dd   :  { %v252_v46 = vpop.permute.xlu0 %251 }
 0x2de   :  { %v254_v47 = vsel %vm151_vm1, %v252_v46, 0.0  ;;  %2073 = vmatmul.mubr.msk.f32.vlgmr.msra.gmra.mrb[2].mxu0 %vm151_vm1, %v252_v46 }
 0x2df   :  { %2062 = vmatmul.mubr.msk.f32.vlgmr.msra.gmra.mrb[0].mxu1 %vm255_vm2, %v254_v47  ;;  %2311 = vmatpush3.bf16.msra.mxu0 %v2719_v33 }
 0x2e0   :  { %2312 = vmatprep.subr.bf16.mxu0 %v2603_v1  ;;  %2323 = vmatpush3.bf16.msra.mxu1 %v2675_v7 }
 0x2e1   :  { %2324 = vmatprep.subr.bf16.mxu1 %v2603_v1  ;;  %2102 = vmatprep.mubr.msk.f32.mxu1 %vm2604_vm0, %v2605_v2 }
 0x2e2   :  { %2091 = vmatprep.mubr.msk.f32.mxu0 %vm2604_vm0, %v2605_v2 }
 0x2e3   :  { %2314 = vmatpush3.bf16.msra.mxu0 %v2725_v35 }
 0x2e4   :  { %2315 = vmatprep.subr.bf16.mxu0 %v2603_v1  ;;  %2326 = vmatpush3.bf16.msra.mxu1 %v2681_v10 }
 0x2e5   :  { %2327 = vmatprep.subr.bf16.mxu1 %v2603_v1 }
 0x2e7   :  { %2317 = vmatpush3.bf16.msra.mxu0 %v2735_v38 }
 0x2e8   :  { %2318 = vmatprep.subr.bf16.mxu0 %v2603_v1 }
 0x2eb   :  { %2320 = vmatpush3.bf16.msra.mxu0 %v2746_v42 }
 0x2ec   :  { %2339 = vmatprep.subr.bf16.mxu0 %v2603_v1 }
 0x3b1   :  { %v423_v53 = vpop.f32.mrb[2].mxu0 }
 0x3b2   :  { %v427_v54 = vadd.f32 %v423_v53, %v354_v51  ;;  %v325_v55 = vpop.f32.mrb[0].mxu1  ;;  %v2074_v56 = vpop.f32.mrb[3].mxu0 }
 0x3b3   :  { %v326_v57 = vadd.f32 %v2779_v52, %v325_v55  ;;  %v2063_v58 = vpop.f32.mrb[1].mxu1 }
 0x3b4   :  { %2454 = vtanh.f32 %v427_v54  ;;  %v1888_v61 = vmul.f32 -1.442695, %v427_v54 }
 0x3b5   :  { %2456 = vtanh.f32 %v326_v57  ;;  %v1886_v62 = vmul.f32 -1.442695, %v326_v57 }
 0x3b6   :  { %2458 = vpow2.f32 %v1888_v61 }
 0x3b7   :  { %2460 = vpow2.f32 %v1886_v62 }
 0x3be   :  { %v2455_v59 = vpop.eup %2454 }
 0x3bf   :  { %v2457_v60 = vpop.eup %2456  ;;  %437 = vrot.lane.b32.xlu1 %v2455_v59, %s2607_s25 }
 0x3c0   :  { %338 = vrot.lane.b32.xlu0 %v2457_v60, %s2607_s25  ;;  %v2459_v63 = vpop.eup %2458 }
 0x3c1   :  { %v2461_v0 = vpop.eup %2460  ;;  %v431_v3 = vadd.f32 1.0, %v2459_v63 }
 0x3c2   :  { %v332_v4 = vadd.f32 1.0, %v2461_v0 }
 0x3c3   :  { %2462 = vrcp.f32 %v431_v3 }
 0x3c4   :  { %2464 = vrcp.f32 %v332_v4 }
 0x3cd   :  { %v2463_v5 = vpop.eup %2462 }
 0x3ce   :  { %v2465_v8 = vpop.eup %2464  ;;  %v435_v15 = vmul.f32 %v2463_v5, %v2707_v29 }
 0x3cf   :  { %v336_v17 = vmul.f32 0.0, %v2465_v8 }
 0x431   :  { %v438_v6 = vpop.permute.xlu1 %437 }
 0x432   :  { %v440_v9 = vmul.f32 %v2463_v5, %v438_v6  ;;  %v339_v13 = vpop.permute.xlu0 %338 }
 0x433   :  { %v341_v14 = vmul.f32 %v2465_v8, %v339_v13 }
 0x434   :  { %442 = vrot.lane.b32.xlu1 %v440_v9, %s2608_s26 }
 0x435   :  { %343 = vrot.lane.b32.xlu0 %v341_v14, %s2608_s26  ;;  %v48_v14 = vld [vmem:[%s3060_s0 + $0x6] sm:$0x3] }
 0x4a6   :  { %v443_v16 = vpop.permute.xlu1 %442 }
 0x4a7   :  { %v2787_v18 = vadd.f32 %v443_v16, %v435_v15  ;;  %v344_v19 = vpop.permute.xlu0 %343 }
 0x4a8   :  { %v2789_v20 = vadd.f32 %v344_v19, %v336_v17 }
 0x4a9   :  { %2466 = vtanh.f32 %v2787_v18 }
 0x4aa   :  { %2468 = vtanh.f32 %v2789_v20 }
 0x4b3   :  { %v2467_v21 = vpop.eup %2466 }
 0x4b4   :  { %v2469_v22 = vpop.eup %2468  ;;  %448 = vrot.lane.b32.xlu1 %v2467_v21, %s2607_s25 }
 0x4b5   :  { %349 = vrot.lane.b32.xlu0 %v2469_v22, %s2607_s25 }
 0x526   :  { %v449_v23 = vpop.permute.xlu1 %448 }
 0x527   :  { %v451_v24 = vmul.f32 %v2463_v5, %v449_v23  ;;  %v350_v25 = vpop.permute.xlu0 %349 }
 0x528   :  { %v352_v26 = vmul.f32 %v2465_v8, %v350_v25 }
 0x529   :  { %453 = vrot.lane.b32.xlu0 %v451_v24, %s2608_s26 }
 0x52a   :  { %457 = vrot.lane.b32.xlu1 %v352_v26, %s2607_s25 }
 0x52d   :  { %66 = vperm.xlu0 %2444, %v47_v27  }
 0x59b   :  { %v454_v28 = vpop.permute.xlu0 %453 }
 0x59c   :  { %2103 = vmatmul.mubr.msk.f32.vlgmr.msra.gmra.mrb[2].mxu1 %vm151_vm1, %v454_v28  ;;  %v458_v29 = vpop.permute.xlu1 %457 }
 0x59d   :  { %v460_v30 = vsel %vm151_vm1, %v454_v28, %v458_v29  ;;  %2329 = vmatpush3.bf16.msra.mxu1 %v2719_v33  ;;  %2121 = vmatprep.mubr.msk.f32.mxu1 %vm2604_vm0, %v2605_v2 }
 0x59e   :  { %2092 = vmatmul.mubr.msk.f32.vlgmr.msra.gmra.mrb[4].mxu0 %vm255_vm2, %v460_v30  ;;  %2330 = vmatprep.subr.bf16.mxu1 %v2603_v1 }
 0x59f   :  { %2341 = vmatpush3.bf16.msra.mxu0 %v2675_v7  ;;  %2132 = vmatprep.mubr.msk.f32.mxu0 %vm2604_vm0, %v2605_v2 }
 0x5a0   :  { %2342 = vmatprep.subr.bf16.mxu0 %v2603_v1 }
 0x5a1   :  { %2332 = vmatpush3.bf16.msra.mxu1 %v2725_v35 }
 0x5a2   :  { %2333 = vmatprep.subr.bf16.mxu1 %v2603_v1 }
 0x5a3   :  { %2344 = vmatpush3.bf16.msra.mxu0 %v2681_v10 }
 0x5a4   :  { %2345 = vmatprep.subr.bf16.mxu0 %v2603_v1 }
 0x5a5   :  { %2335 = vmatpush3.bf16.msra.mxu1 %v2735_v38 }
 0x5a6   :  { %2336 = vmatprep.subr.bf16.mxu1 %v2603_v1 }
 0x5a9   :  { %2338 = vmatpush3.bf16.msra.mxu1 %v2746_v42 }
 0x5aa   :  { %2357 = vmatprep.subr.bf16.mxu1 %v2603_v1 }
 0x5ac   :  { %v67_v31 = vpop.permute.xlu0 %66 }
 0x5ad   :  { %v102_v32 = vmul.f32 %v2696_v11, %v67_v31 }
 0x5af   :  { %v117_v34 = vadd.f32 %v2701_v12, %v102_v32 }
 0x5b1   :  { %125 = vst [vmem:[#allocation2 + $0x4] sm:$0x3] %v117_v34 }
 0x5b8   :  { %v559_v36 = vld [vmem:[#allocation2 + $0x4] sm:$0x3] }
 0x66f   :  { %v628_v37 = vpop.f32.mrb[2].mxu1 }
 0x670   :  { %v632_v39 = vadd.f32 %v628_v37, %v559_v36  ;;  %v2104_v40 = vpop.f32.mrb[3].mxu1 }
 0x671   :  { %v530_v41 = vpop.f32.mrb[4].mxu0 }
 0x672   :  { %2470 = vtanh.f32 %v632_v39  ;;  %v531_v43 = vadd.f32 %v2779_v52, %v530_v41  ;;  %v2093_v44 = vpop.f32.mrb[5].mxu0  ;;  %v1892_v47 = vmul.f32 -1.442695, %v632_v39 }
 0x674   :  { %2472 = vtanh.f32 %v531_v43  ;;  %v1890_v48 = vmul.f32 -1.442695, %v531_v43 }
 0x675   :  { %2474 = vpow2.f32 %v1892_v47 }
 0x676   :  { %2476 = vpow2.f32 %v1890_v48 }
 0x67c   :  { %v2471_v45 = vpop.eup %2470 }
 0x67d   :  { %642 = vrot.lane.b32.xlu0 %v2471_v45, %s2607_s25 }
 0x67e   :  { %v2473_v46 = vpop.eup %2472 }
 0x67f   :  { %543 = vrot.lane.b32.xlu1 %v2473_v46, %s2607_s25  ;;  %v2475_v49 = vpop.eup %2474 }
 0x680   :  { %v2477_v50 = vpop.eup %2476  ;;  %v636_v51 = vadd.f32 1.0, %v2475_v49 }
 0x681   :  { %v537_v53 = vadd.f32 1.0, %v2477_v50 }
 0x682   :  { %2478 = vrcp.f32 %v636_v51 }
 0x683   :  { %2480 = vrcp.f32 %v537_v53 }
 0x68c   :  { %v2479_v54 = vpop.eup %2478 }
 0x68d   :  { %v2481_v57 = vpop.eup %2480  ;;  %v640_v60 = vmul.f32 %v2479_v54, %v2787_v18 }
 0x68e   :  { %v541_v63 = vmul.f32 %v2481_v57, %v2789_v20 }
 0x6ef   :  { %v643_v55 = vpop.permute.xlu0 %642 }
 0x6f0   :  { %v645_v56 = vmul.f32 %v2479_v54, %v643_v55 }
 0x6f1   :  { %v544_v58 = vpop.permute.xlu1 %543 }
 0x6f2   :  { %647 = vrot.lane.b32.xlu0 %v645_v56, %s2608_s26  ;;  %v546_v59 = vmul.f32 %v2481_v57, %v544_v58  ;;  %v49_v58 = vld [vmem:[%s3060_s0 + $0x8] sm:$0x3] }
 0x6f4   :  { %548 = vrot.lane.b32.xlu1 %v546_v59, %s2608_s26 }
 0x764   :  { %v648_v61 = vpop.permute.xlu0 %647 }
 0x765   :  { %v2827_v62 = vadd.f32 %v648_v61, %v640_v60 }
 0x766   :  { %v549_v0 = vpop.permute.xlu1 %548 }
 0x767   :  { %2482 = vtanh.f32 %v2827_v62  ;;  %v2831_v3 = vadd.f32 %v549_v0, %v541_v63 }
 0x769   :  { %2484 = vtanh.f32 %v2831_v3 }
 0x771   :  { %v2483_v4 = vpop.eup %2482 }
 0x772   :  { %653 = vrot.lane.b32.xlu0 %v2483_v4, %s2607_s25 }
 0x773   :  { %v2485_v5 = vpop.eup %2484 }
 0x774   :  { %554 = vrot.lane.b32.xlu1 %v2485_v5, %s2607_s25 }
 0x7e4   :  { %v654_v6 = vpop.permute.xlu0 %653 }
 0x7e5   :  { %v656_v8 = vmul.f32 %v2479_v54, %v654_v6 }
 0x7e6   :  { %v555_v9 = vpop.permute.xlu1 %554 }
 0x7e7   :  { %658 = vrot.lane.b32.xlu1 %v656_v8, %s2608_s26  ;;  %v557_v13 = vmul.f32 %v2481_v57, %v555_v9 }
 0x7e9   :  { %662 = vrot.lane.b32.xlu0 %v557_v13, %s2607_s25 }
 0x7eb   :  { %71 = vperm.xlu1 %2445, %v48_v14  }
 0x859   :  { %v659_v15 = vpop.permute.xlu1 %658 }
 0x85a   :  { %2133 = vmatmul.mubr.msk.f32.vlgmr.msra.gmra.mrb[6].mxu0 %vm151_vm1, %v659_v15 }
 0x85b   :  { %2347 = vmatpush3.bf16.msra.mxu0 %v2719_v33  ;;  %2151 = vmatprep.mubr.msk.f32.mxu0 %vm2604_vm0, %v2605_v2  ;;  %v663_v16 = vpop.permute.xlu0 %662 }
 0x85c   :  { %2348 = vmatprep.subr.bf16.mxu0 %v2603_v1  ;;  %v665_v17 = vsel %vm151_vm1, %v659_v15, %v663_v16 }
 0x85d   :  { %2122 = vmatmul.mubr.msk.f32.vlgmr.msra.gmra.mrb[4].mxu1 %vm255_vm2, %v665_v17 }
 0x85e   :  { %2359 = vmatpush3.bf16.msra.mxu1 %v2675_v7  ;;  %2162 = vmatprep.mubr.msk.f32.mxu1 %vm2604_vm0, %v2605_v2 }
 0x85f   :  { %2350 = vmatpush3.bf16.msra.mxu0 %v2725_v35  ;;  %2360 = vmatprep.subr.bf16.mxu1 %v2603_v1 }
 0x860   :  { %2351 = vmatprep.subr.bf16.mxu0 %v2603_v1 }
 0x862   :  { %2362 = vmatpush3.bf16.msra.mxu1 %v2681_v10 }
 0x863   :  { %2353 = vmatpush3.bf16.msra.mxu0 %v2735_v38  ;;  %2363 = vmatprep.subr.bf16.mxu1 %v2603_v1 }
 0x864   :  { %2354 = vmatprep.subr.bf16.mxu0 %v2603_v1 }
 0x867   :  { %2356 = vmatpush3.bf16.msra.mxu0 %v2746_v42 }
 0x868   :  { %2375 = vmatprep.subr.bf16.mxu0 %v2603_v1 }
 0x86a   :  { %v72_v18 = vpop.permute.xlu1 %71 }
 0x86b   :  { %v103_v19 = vmul.f32 %v2696_v11, %v72_v18 }
 0x86d   :  { %v118_v20 = vadd.f32 %v2701_v12, %v103_v19 }
 0x86f   :  { %126 = vst [vmem:[#allocation2 + $0x6] sm:$0x3] %v118_v20 }
 0x876   :  { %v764_v21 = vld [vmem:[#allocation2 + $0x6] sm:$0x3] }
 0x92d   :  { %v833_v22 = vpop.f32.mrb[6].mxu0 }
 0x92e   :  { %v837_v23 = vadd.f32 %v833_v22, %v764_v21  ;;  %v2134_v24 = vpop.f32.mrb[7].mxu0 }
 0x930   :  { %2486 = vtanh.f32 %v837_v23  ;;  %v735_v25 = vpop.f32.mrb[4].mxu1  ;;  %v1896_v30 = vmul.f32 -1.442695, %v837_v23 }
 0x931   :  { %v736_v26 = vadd.f32 %v2779_v52, %v735_v25  ;;  %v2123_v27 = vpop.f32.mrb[5].mxu1 }
 0x933   :  { %2488 = vtanh.f32 %v736_v26  ;;  %v1894_v31 = vmul.f32 -1.442695, %v736_v26 }
 0x934   :  { %2490 = vpow2.f32 %v1896_v30 }
 0x935   :  { %2492 = vpow2.f32 %v1894_v31 }
 0x93a   :  { %v2487_v28 = vpop.eup %2486 }
 0x93b   :  { %847 = vrot.lane.b32.xlu1 %v2487_v28, %s2607_s25 }
 0x93d   :  { %v2489_v29 = vpop.eup %2488 }
 0x93e   :  { %748 = vrot.lane.b32.xlu0 %v2489_v29, %s2607_s25  ;;  %v2491_v32 = vpop.eup %2490 }
 0x93f   :  { %v841_v34 = vadd.f32 1.0, %v2491_v32  ;;  %v2493_v36 = vpop.eup %2492 }
 0x940   :  { %v742_v37 = vadd.f32 1.0, %v2493_v36 }
 0x941   :  { %2494 = vrcp.f32 %v841_v34 }
 0x942   :  { %2496 = vrcp.f32 %v742_v37 }
 0x94b   :  { %v2495_v39 = vpop.eup %2494 }
 0x94c   :  { %v2497_v43 = vpop.eup %2496  ;;  %v845_v46 = vmul.f32 %v2495_v39, %v2827_v62 }
 0x94d   :  { %v746_v49 = vmul.f32 %v2497_v43, %v2831_v3 }
 0x9ad   :  { %v848_v40 = vpop.permute.xlu1 %847 }
 0x9ae   :  { %v850_v41 = vmul.f32 %v2495_v39, %v848_v40 }
 0x9b0   :  { %852 = vrot.lane.b32.xlu1 %v850_v41, %s2608_s26  ;;  %v749_v44 = vpop.permute.xlu0 %748 }
 0x9b1   :  { %v751_v45 = vmul.f32 %v2497_v43, %v749_v44 }
 0x9b3   :  { %753 = vrot.lane.b32.xlu0 %v751_v45, %s2608_s26 }
 0xa22   :  { %v853_v47 = vpop.permute.xlu1 %852 }
 0xa23   :  { %v2868_v48 = vadd.f32 %v853_v47, %v845_v46 }
 0xa25   :  { %2498 = vtanh.f32 %v2868_v48  ;;  %v754_v50 = vpop.permute.xlu0 %753 }
 0xa26   :  { %v2872_v51 = vadd.f32 %v754_v50, %v746_v49 }
 0xa28   :  { %2500 = vtanh.f32 %v2872_v51 }
 0xa2f   :  { %v2499_v53 = vpop.eup %2498 }
 0xa30   :  { %858 = vrot.lane.b32.xlu1 %v2499_v53, %s2607_s25 }
 0xa32   :  { %v2501_v54 = vpop.eup %2500 }
 0xa33   :  { %759 = vrot.lane.b32.xlu0 %v2501_v54, %s2607_s25 }
 0xaa2   :  { %v859_v55 = vpop.permute.xlu1 %858 }
 0xaa3   :  { %v861_v56 = vmul.f32 %v2495_v39, %v859_v55 }
 0xaa5   :  { %863 = vrot.lane.b32.xlu0 %v861_v56, %s2608_s26  ;;  %v760_v57 = vpop.permute.xlu0 %759 }
 0xaa6   :  { %v762_v59 = vmul.f32 %v2497_v43, %v760_v57  ;;  %v50_v43 = vld [vmem:[%s3060_s0 + $0xa] sm:$0x3] }
 0xaa8   :  { %867 = vrot.lane.b32.xlu1 %v762_v59, %s2607_s25 }
 0xaa9   :  { %76 = vperm.xlu0 %2444, %v49_v58  }
 0xb17   :  { %v864_v60 = vpop.permute.xlu0 %863 }
 0xb18   :  { %2163 = vmatmul.mubr.msk.f32.vlgmr.msra.gmra.mrb[6].mxu1 %vm151_vm1, %v864_v60 }
 0xb19   :  { %2365 = vmatpush3.bf16.msra.mxu1 %v2719_v33  ;;  %2181 = vmatprep.mubr.msk.f32.mxu1 %vm2604_vm0, %v2605_v2 }
 0xb1a   :  { %2366 = vmatprep.subr.bf16.mxu1 %v2603_v1  ;;  %v868_v61 = vpop.permute.xlu1 %867 }
 0xb1b   :  { %v870_v62 = vsel %vm151_vm1, %v864_v60, %v868_v61 }
 0xb1c   :  { %2152 = vmatmul.mubr.msk.f32.vlgmr.msra.gmra.mrb[8].mxu0 %vm255_vm2, %v870_v62 }
 0xb1d   :  { %2368 = vmatpush3.bf16.msra.mxu1 %v2725_v35  ;;  %2377 = vmatpush3.bf16.msra.mxu0 %v2675_v7 }
 0xb1e   :  { %2369 = vmatprep.subr.bf16.mxu1 %v2603_v1  ;;  %2378 = vmatprep.subr.bf16.mxu0 %v2603_v1 }
 0xb1f   :  { %2192 = vmatprep.mubr.msk.f32.mxu0 %vm2604_vm0, %v2605_v2 }
 0xb21   :  { %2371 = vmatpush3.bf16.msra.mxu1 %v2735_v38  ;;  %2380 = vmatpush3.bf16.msra.mxu0 %v2681_v10 }
 0xb22   :  { %2372 = vmatprep.subr.bf16.mxu1 %v2603_v1  ;;  %2381 = vmatprep.subr.bf16.mxu0 %v2603_v1 }
 0xb25   :  { %2374 = vmatpush3.bf16.msra.mxu1 %v2746_v42 }
 0xb26   :  { %2393 = vmatprep.subr.bf16.mxu1 %v2603_v1 }
 0xb28   :  { %v77_v63 = vpop.permute.xlu0 %76 }
 0xb29   :  { %v104_v0 = vmul.f32 %v2696_v11, %v77_v63 }
 0xb2b   :  { %v119_v3 = vadd.f32 %v2701_v12, %v104_v0 }
 0xb2d   :  { %127 = vst [vmem:[#allocation2 + $0x8] sm:$0x3] %v119_v3 }
 0xb34   :  { %v969_v4 = vld [vmem:[#allocation2 + $0x8] sm:$0x3] }
 0xbeb   :  { %v1038_v5 = vpop.f32.mrb[6].mxu1 }
 0xbec   :  { %v1042_v6 = vadd.f32 %v1038_v5, %v969_v4  ;;  %v2164_v8 = vpop.f32.mrb[7].mxu1 }
 0xbee   :  { %2502 = vtanh.f32 %v1042_v6  ;;  %v1900_v17 = vmul.f32 -1.442695, %v1042_v6 }
 0xbef   :  { %v940_v9 = vpop.f32.mrb[8].mxu0 }
 0xbf0   :  { %v941_v13 = vadd.f32 %v2779_v52, %v940_v9  ;;  %v2153_v14 = vpop.f32.mrb[9].mxu0 }
 0xbf2   :  { %2504 = vtanh.f32 %v941_v13  ;;  %v1898_v18 = vmul.f32 -1.442695, %v941_v13 }
 0xbf3   :  { %2506 = vpow2.f32 %v1900_v17 }
 0xbf4   :  { %2508 = vpow2.f32 %v1898_v18 }
 0xbf8   :  { %v2503_v15 = vpop.eup %2502 }
 0xbf9   :  { %1052 = vrot.lane.b32.xlu0 %v2503_v15, %s2607_s25 }
 0xbfc   :  { %v2505_v16 = vpop.eup %2504 }
 0xbfd   :  { %953 = vrot.lane.b32.xlu1 %v2505_v16, %s2607_s25  ;;  %v2507_v19 = vpop.eup %2506 }
 0xbfe   :  { %v1046_v20 = vadd.f32 1.0, %v2507_v19  ;;  %v2509_v21 = vpop.eup %2508 }
 0xbff   :  { %v947_v22 = vadd.f32 1.0, %v2509_v21 }
 0xc00   :  { %2510 = vrcp.f32 %v1046_v20 }
 0xc01   :  { %2512 = vrcp.f32 %v947_v22 }
 0xc0a   :  { %v2511_v23 = vpop.eup %2510 }
 0xc0b   :  { %v2513_v26 = vpop.eup %2512  ;;  %v1050_v29 = vmul.f32 %v2511_v23, %v2868_v48 }
 0xc0c   :  { %v951_v32 = vmul.f32 %v2513_v26, %v2872_v51 }
 0xc6b   :  { %v1053_v24 = vpop.permute.xlu0 %1052 }
 0xc6c   :  { %v1055_v25 = vmul.f32 %v2511_v23, %v1053_v24 }
 0xc6e   :  { %1057 = vrot.lane.b32.xlu0 %v1055_v25, %s2608_s26 }
 0xc6f   :  { %v954_v27 = vpop.permute.xlu1 %953 }
 0xc70   :  { %v956_v28 = vmul.f32 %v2513_v26, %v954_v27 }
 0xc72   :  { %958 = vrot.lane.b32.xlu1 %v956_v28, %s2608_s26 }
 0xce0   :  { %v1058_v30 = vpop.permute.xlu0 %1057 }
 0xce1   :  { %v2909_v31 = vadd.f32 %v1058_v30, %v1050_v29 }
 0xce3   :  { %2514 = vtanh.f32 %v2909_v31 }
 0xce4   :  { %v959_v34 = vpop.permute.xlu1 %958 }
 0xce5   :  { %v2913_v36 = vadd.f32 %v959_v34, %v951_v32 }
 0xce7   :  { %2516 = vtanh.f32 %v2913_v36 }
 0xced   :  { %v2515_v37 = vpop.eup %2514 }
 0xcee   :  { %1063 = vrot.lane.b32.xlu0 %v2515_v37, %s2607_s25 }
 0xcf1   :  { %v2517_v39 = vpop.eup %2516 }
 0xcf2   :  { %964 = vrot.lane.b32.xlu1 %v2517_v39, %s2607_s25 }
 0xd60   :  { %v1064_v40 = vpop.permute.xlu0 %1063 }
 0xd61   :  { %v1066_v41 = vmul.f32 %v2511_v23, %v1064_v40 }
 0xd63   :  { %1068 = vrot.lane.b32.xlu1 %v1066_v41, %s2608_s26 }
 0xd64   :  { %v965_v44 = vpop.permute.xlu1 %964 }
 0xd65   :  { %v967_v45 = vmul.f32 %v2513_v26, %v965_v44  ;;  %v51_v26 = vld [vmem:[%s3060_s0 + $0xc] sm:$0x3] }
 0xd67   :  { %81 = vperm.xlu1 %2445, %v50_v43   ;;  %1072 = vrot.lane.b32.xlu0 %v967_v45, %s2607_s25 }
 0xdd5   :  { %v1069_v46 = vpop.permute.xlu1 %1068 }
 0xdd6   :  { %2193 = vmatmul.mubr.msk.f32.vlgmr.msra.gmra.mrb[10].mxu0 %vm151_vm1, %v1069_v46 }
 0xdd7   :  { %2383 = vmatpush3.bf16.msra.mxu0 %v2719_v33  ;;  %2211 = vmatprep.mubr.msk.f32.mxu0 %vm2604_vm0, %v2605_v2 }
 0xdd8   :  { %2384 = vmatprep.subr.bf16.mxu0 %v2603_v1 }
 0xdd9   :  { %v1073_v47 = vpop.permute.xlu0 %1072 }
 0xdda   :  { %v1075_v48 = vsel %vm151_vm1, %v1069_v46, %v1073_v47 }
 0xddb   :  { %2386 = vmatpush3.bf16.msra.mxu0 %v2725_v35  ;;  %2182 = vmatmul.mubr.msk.f32.vlgmr.msra.gmra.mrb[8].mxu1 %vm255_vm2, %v1075_v48 }
 0xddc   :  { %2387 = vmatprep.subr.bf16.mxu0 %v2603_v1  ;;  %2395 = vmatpush3.bf16.msra.mxu1 %v2675_v7 }
 0xddd   :  { %2222 = vmatprep.mubr.msk.f32.mxu1 %vm2604_vm0, %v2605_v2  ;;  %2396 = vmatprep.subr.bf16.mxu1 %v2603_v1 }
 0xddf   :  { %2389 = vmatpush3.bf16.msra.mxu0 %v2735_v38 }
 0xde0   :  { %2390 = vmatprep.subr.bf16.mxu0 %v2603_v1  ;;  %2398 = vmatpush3.bf16.msra.mxu1 %v2681_v10 }
 0xde1   :  { %2399 = vmatprep.subr.bf16.mxu1 %v2603_v1 }
 0xde3   :  { %2392 = vmatpush3.bf16.msra.mxu0 %v2746_v42 }
 0xde4   :  { %2411 = vmatprep.subr.bf16.mxu0 %v2603_v1 }
 0xde6   :  { %v82_v49 = vpop.permute.xlu1 %81 }
 0xde7   :  { %v105_v50 = vmul.f32 %v2696_v11, %v82_v49 }
 0xde9   :  { %v120_v51 = vadd.f32 %v2701_v12, %v105_v50 }
 0xdeb   :  { %128 = vst [vmem:[#allocation2 + $0xa] sm:$0x3] %v120_v51 }
 0xdf2   :  { %v1174_v53 = vld [vmem:[#allocation2 + $0xa] sm:$0x3] }
 0xea9   :  { %v1243_v54 = vpop.f32.mrb[10].mxu0 }
 0xeaa   :  { %v1247_v55 = vadd.f32 %v1243_v54, %v1174_v53  ;;  %v2194_v56 = vpop.f32.mrb[11].mxu0 }
 0xeac   :  { %2518 = vtanh.f32 %v1247_v55  ;;  %v1904_v62 = vmul.f32 -1.442695, %v1247_v55 }
 0xeae   :  { %v1145_v57 = vpop.f32.mrb[8].mxu1 }
 0xeaf   :  { %v1146_v58 = vadd.f32 %v2779_v52, %v1145_v57  ;;  %v2183_v59 = vpop.f32.mrb[9].mxu1 }
 0xeb1   :  { %2520 = vtanh.f32 %v1146_v58  ;;  %v1902_v63 = vmul.f32 -1.442695, %v1146_v58 }
 0xeb2   :  { %2522 = vpow2.f32 %v1904_v62 }
 0xeb3   :  { %2524 = vpow2.f32 %v1902_v63 }
 0xeb6   :  { %v2519_v60 = vpop.eup %2518 }
 0xeb7   :  { %1257 = vrot.lane.b32.xlu1 %v2519_v60, %s2607_s25 }
 0xebb   :  { %v2521_v61 = vpop.eup %2520 }
 0xebc   :  { %1158 = vrot.lane.b32.xlu0 %v2521_v61, %s2607_s25  ;;  %v2523_v0 = vpop.eup %2522 }
 0xebd   :  { %v1251_v3 = vadd.f32 1.0, %v2523_v0  ;;  %v2525_v4 = vpop.eup %2524 }
 0xebe   :  { %v1152_v5 = vadd.f32 1.0, %v2525_v4 }
 0xebf   :  { %2526 = vrcp.f32 %v1251_v3 }
 0xec0   :  { %2528 = vrcp.f32 %v1152_v5  ;;  %v52_v5 = vld [vmem:[%s3060_s0 + $0xe] sm:$0x3] }
 0xec9   :  { %v2527_v6 = vpop.eup %2526 }
 0xeca   :  { %v2529_v13 = vpop.eup %2528  ;;  %v1255_v16 = vmul.f32 %v2527_v6, %v2909_v31 }
 0xecb   :  { %v1156_v19 = vmul.f32 %v2529_v13, %v2913_v36 }
 0xf29   :  { %v1258_v8 = vpop.permute.xlu1 %1257 }
 0xf2a   :  { %v1260_v9 = vmul.f32 %v2527_v6, %v1258_v8 }
 0xf2c   :  { %1262 = vrot.lane.b32.xlu1 %v1260_v9, %s2608_s26 }
 0xf2e   :  { %v1159_v14 = vpop.permute.xlu0 %1158 }
 0xf2f   :  { %v1161_v15 = vmul.f32 %v2529_v13, %v1159_v14 }
 0xf31   :  { %1163 = vrot.lane.b32.xlu0 %v1161_v15, %s2608_s26 }
 0xf9e   :  { %v1263_v17 = vpop.permute.xlu1 %1262 }
 0xf9f   :  { %v2950_v18 = vadd.f32 %v1263_v17, %v1255_v16  ;;  %v2575_v16 = vld [vmem:[%s3062_s2] ss:$0 sm:$0xff] }
 0xfa1   :  { %2530 = vtanh.f32 %v2950_v18 }
 0xfa3   :  { %v1164_v20 = vpop.permute.xlu0 %1163 }
 0xfa4   :  { %v2954_v21 = vadd.f32 %v1164_v20, %v1156_v19 }
 0xfa6   :  { %2532 = vtanh.f32 %v2954_v21 }
 0xfab   :  { %v2531_v22 = vpop.eup %2530 }
 0xfac   :  { %1268 = vrot.lane.b32.xlu1 %v2531_v22, %s2607_s25 }
 0xfb0   :  { %v2533_v23 = vpop.eup %2532 }
 0xfb1   :  { %1169 = vrot.lane.b32.xlu0 %v2533_v23, %s2607_s25 }
0x101e   :  { %v1269_v24 = vpop.permute.xlu1 %1268 }
0x101f   :  { %v1271_v25 = vmul.f32 %v2527_v6, %v1269_v24 }
0x1021   :  { %1273 = vrot.lane.b32.xlu0 %v1271_v25, %s2608_s26 }
0x1023   :  { %v1170_v27 = vpop.permute.xlu0 %1169 }
0x1024   :  { %v1172_v28 = vmul.f32 %v2529_v13, %v1170_v27 }
0x1025   :  { %86 = vperm.xlu0 %2444, %v51_v26  }
0x1026   :  { %1277 = vrot.lane.b32.xlu1 %v1172_v28, %s2607_s25 }
0x1093   :  { %v1274_v29 = vpop.permute.xlu0 %1273 }
0x1094   :  { %2223 = vmatmul.mubr.msk.f32.vlgmr.msra.gmra.mrb[10].mxu1 %vm151_vm1, %v1274_v29 }
0x1095   :  { %2401 = vmatpush3.bf16.msra.mxu1 %v2719_v33  ;;  %2241 = vmatprep.mubr.msk.f32.mxu1 %vm2604_vm0, %v2605_v2 }
0x1096   :  { %2402 = vmatprep.subr.bf16.mxu1 %v2603_v1 }
0x1098   :  { %v1278_v30 = vpop.permute.xlu1 %1277 }
0x1099   :  { %2404 = vmatpush3.bf16.msra.mxu1 %v2725_v35  ;;  %v1280_v31 = vsel %vm151_vm1, %v1274_v29, %v1278_v30 }
0x109a   :  { %2405 = vmatprep.subr.bf16.mxu1 %v2603_v1  ;;  %2212 = vmatmul.mubr.msk.f32.vlgmr.msra.gmra.mrb[12].mxu0 %vm255_vm2, %v1280_v31 }
0x109b   :  { %2413 = vmatpush3.bf16.msra.mxu0 %v2675_v7  ;;  %2252 = vmatprep.mubr.msk.f32.mxu0 %vm2604_vm0, %v2605_v2 }
0x109c   :  { %2414 = vmatprep.subr.bf16.mxu0 %v2603_v1 }
0x109d   :  { %2407 = vmatpush3.bf16.msra.mxu1 %v2735_v38 }
0x109e   :  { %2408 = vmatprep.subr.bf16.mxu1 %v2603_v1 }
0x109f   :  { %2416 = vmatpush3.bf16.msra.mxu0 %v2681_v10 }
0x10a0   :  { %2417 = vmatprep.subr.bf16.mxu0 %v2603_v1 }
0x10a1   :  { %2410 = vmatpush3.bf16.msra.mxu1 %v2746_v42 }
0x10a2   :  { %2429 = vmatprep.subr.bf16.mxu1 %v2603_v1 }
0x10a4   :  { %v87_v32 = vpop.permute.xlu0 %86 }
0x10a5   :  { %v106_v7 = vmul.f32 %v2696_v11, %v87_v32 }
0x10a7   :  { %v121_v34 = vadd.f32 %v2701_v12, %v106_v7 }
0x10a9   :  { %129 = vst [vmem:[#allocation2 + $0xc] sm:$0x3] %v121_v34 }
0x10b0   :  { %v1379_v36 = vld [vmem:[#allocation2 + $0xc] sm:$0x3] }
0x1167   :  { %v1448_v37 = vpop.f32.mrb[10].mxu1 }
0x1168   :  { %v1452_v39 = vadd.f32 %v1448_v37, %v1379_v36  ;;  %v2224_v40 = vpop.f32.mrb[11].mxu1 }
0x116a   :  { %2534 = vtanh.f32 %v1452_v39  ;;  %v1908_v11 = vmul.f32 -1.442695, %v1452_v39 }
0x116d   :  { %v1350_v41 = vpop.f32.mrb[12].mxu0 }
0x116e   :  { %v1351_v10 = vadd.f32 %v2779_v52, %v1350_v41  ;;  %v2213_v43 = vpop.f32.mrb[13].mxu0 }
0x1170   :  { %2536 = vtanh.f32 %v1351_v10  ;;  %v1906_v12 = vmul.f32 -1.442695, %v1351_v10 }
0x1171   :  { %2538 = vpow2.f32 %v1908_v11 }
0x1172   :  { %2540 = vpow2.f32 %v1906_v12 }
0x1174   :  { %v2535_v44 = vpop.eup %2534 }
0x1175   :  { %1462 = vrot.lane.b32.xlu0 %v2535_v44, %s2607_s25 }
0x117a   :  { %v2537_v45 = vpop.eup %2536 }
0x117b   :  { %1363 = vrot.lane.b32.xlu1 %v2537_v45, %s2607_s25  ;;  %v2539_v46 = vpop.eup %2538 }
0x117c   :  { %v1456_v47 = vadd.f32 1.0, %v2539_v46  ;;  %v2541_v48 = vpop.eup %2540 }
0x117d   :  { %v1357_v49 = vadd.f32 1.0, %v2541_v48 }
0x117e   :  { %2542 = vrcp.f32 %v1456_v47 }
0x117f   :  { %2544 = vrcp.f32 %v1357_v49 }
0x1188   :  { %v2543_v50 = vpop.eup %2542 }
0x1189   :  { %v2545_v54 = vpop.eup %2544  ;;  %v1460_v57 = vmul.f32 %v2543_v50, %v2950_v18 }
0x118a   :  { %v1361_v60 = vmul.f32 %v2545_v54, %v2954_v21 }
0x11e7   :  { %v1463_v51 = vpop.permute.xlu0 %1462 }
0x11e8   :  { %v1465_v53 = vmul.f32 %v2543_v50, %v1463_v51 }
0x11ea   :  { %1467 = vrot.lane.b32.xlu0 %v1465_v53, %s2608_s26 }
0x11ed   :  { %v1364_v55 = vpop.permute.xlu1 %1363 }
0x11ee   :  { %v1366_v56 = vmul.f32 %v2545_v54, %v1364_v55 }
0x11f0   :  { %1368 = vrot.lane.b32.xlu1 %v1366_v56, %s2608_s26 }
0x125c   :  { %v1468_v58 = vpop.permute.xlu0 %1467 }
0x125d   :  { %v2991_v59 = vadd.f32 %v1468_v58, %v1460_v57 }
0x125f   :  { %2546 = vtanh.f32 %v2991_v59 }
0x1262   :  { %v1369_v61 = vpop.permute.xlu1 %1368 }
0x1263   :  { %v2995_v62 = vadd.f32 %v1369_v61, %v1361_v60 }
0x1265   :  { %2548 = vtanh.f32 %v2995_v62 }
0x1269   :  { %v2547_v63 = vpop.eup %2546 }
0x126a   :  { %1473 = vrot.lane.b32.xlu0 %v2547_v63, %s2607_s25 }
0x126f   :  { %v2549_v0 = vpop.eup %2548 }
0x1270   :  { %1374 = vrot.lane.b32.xlu1 %v2549_v0, %s2607_s25 }
0x12dc   :  { %v1474_v3 = vpop.permute.xlu0 %1473 }
0x12dd   :  { %v1476_v4 = vmul.f32 %v2543_v50, %v1474_v3  ;;  %v1789_v3 = vld [vmem:[%s3066_s6 + $0x8] sm:$0xff] }
0x12df   :  { %1478 = vrot.lane.b32.xlu1 %v1476_v4, %s2608_s26  ;;  %v1790_v4 = vld [vmem:[%s3066_s6 + $0x10] sm:$0xff] }
0x12e2   :  { %v1375_v6 = vpop.permute.xlu1 %1374 }
0x12e3   :  { %91 = vperm.xlu1 %2445, %v52_v5   ;;  %v1377_v8 = vmul.f32 %v2545_v54, %v1375_v6  ;;  %v1791_v6 = vld [vmem:[%s3066_s6 + $0x18] sm:$0xff] }
0x12e5   :  { %1482 = vrot.lane.b32.xlu0 %v1377_v8, %s2607_s25  ;;  %v2433_v8 = vpack.c.bf16 %v1791_v6, %v1790_v4 }
0x1351   :  { %v1479_v9 = vpop.permute.xlu1 %1478 }
0x1352   :  { %2253 = vmatmul.mubr.msk.f32.vlgmr.msra.gmra.mrb[14].mxu0 %vm151_vm1, %v1479_v9 }
0x1353   :  { %2419 = vmatpush3.bf16.msra.mxu0 %v2719_v33  ;;  %2271 = vmatprep.mubr.msk.f32.mxu0 %vm2604_vm0, %v2605_v2 }
0x1354   :  { %2420 = vmatprep.subr.bf16.mxu0 %v2603_v1 }
0x1357   :  { %2422 = vmatpush3.bf16.msra.mxu0 %v2725_v35  ;;  %v1483_v13 = vpop.permute.xlu0 %1482  ;;  %v2574_v35 = vld [vmem:[%s3061_s1] ss:$0 sm:$0xff] }
0x1358   :  { %2423 = vmatprep.subr.bf16.mxu0 %v2603_v1  ;;  %v1485_v14 = vsel %vm151_vm1, %v1479_v9, %v1483_v13 }
0x1359   :  { %2242 = vmatmul.mubr.msk.f32.vlgmr.msra.gmra.mrb[12].mxu1 %vm255_vm2, %v1485_v14 }
0x135a   :  { %2282 = vmatprep.mubr.msk.f32.mxu1 %vm2604_vm0, %v2605_v2 }
0x135b   :  { %2425 = vmatpush3.bf16.msra.mxu0 %v2735_v38 }
0x135c   :  { %2426 = vmatprep.subr.bf16.mxu0 %v2603_v1 }
0x135f   :  { %2428 = vmatpush3.bf16.msra.mxu0 %v2746_v42 }
0x1362   :  { %v92_v33 = vpop.permute.xlu1 %91 }
0x1363   :  { %v107_v15 = vmul.f32 %v2574_v35, %v92_v33  ;;  %v1915_v35 = vld [vmem:[#allocation3] ss:$0 sm:$0xff] }
0x1365   :  { %v122_v17 = vadd.f32 %v2575_v16, %v107_v15 }
0x1367   :  { %130 = vst [vmem:[#allocation2 + $0xe] sm:$0x3] %v122_v17 }
0x136e   :  { %v1584_v38 = vld [vmem:[#allocation2 + $0xe] sm:$0x3] }
0x1425   :  { %v1653_v18 = vpop.f32.mrb[14].mxu0 }
0x1426   :  { %v1657_v19 = vadd.f32 %v1653_v18, %v1584_v38  ;;  %v2254_v2 = vpop.f32.mrb[15].mxu0 }
0x1428   :  { %2550 = vtanh.f32 %v1657_v19  ;;  %v1912_v24 = vmul.f32 -1.442695, %v1657_v19 }
0x142c   :  { %v1555_v20 = vpop.f32.mrb[12].mxu1 }
0x142d   :  { %v1556_v42 = vadd.f32 %v2779_v52, %v1555_v20  ;;  %v2243_v21 = vpop.f32.mrb[13].mxu1 }
0x142f   :  { %2552 = vtanh.f32 %v1556_v42  ;;  %v1910_v25 = vmul.f32 -1.442695, %v1556_v42 }
0x1430   :  { %2554 = vpow2.f32 %v1912_v24 }
0x1431   :  { %2556 = vpow2.f32 %v1910_v25 }
0x1432   :  { %v2551_v22 = vpop.eup %2550 }
0x1433   :  { %1667 = vrot.lane.b32.xlu1 %v2551_v22, %s2607_s25 }
0x1439   :  { %v2553_v23 = vpop.eup %2552 }
0x143a   :  { %1568 = vrot.lane.b32.xlu0 %v2553_v23, %s2607_s25  ;;  %v2555_v26 = vpop.eup %2554 }
0x143b   :  { %v1661_v27 = vadd.f32 1.0, %v2555_v26  ;;  %v2557_v28 = vpop.eup %2556 }
0x143c   :  { %v1562_v29 = vadd.f32 1.0, %v2557_v28 }
0x143d   :  { %2558 = vrcp.f32 %v1661_v27 }
0x143e   :  { %2560 = vrcp.f32 %v1562_v29 }
0x1447   :  { %v2559_v30 = vpop.eup %2558 }
0x1448   :  { %v2561_v7 = vpop.eup %2560  ;;  %v1665_v37 = vmul.f32 %v2559_v30, %v2991_v59 }
0x1449   :  { %v1566_v41 = vmul.f32 %v2561_v7, %v2995_v62 }
0x14a5   :  { %v1668_v31 = vpop.permute.xlu1 %1667 }
0x14a6   :  { %v1670_v32 = vmul.f32 %v2559_v30, %v1668_v31 }
0x14a8   :  { %1672 = vrot.lane.b32.xlu1 %v1670_v32, %s2608_s26 }
0x14ac   :  { %v1569_v34 = vpop.permute.xlu0 %1568 }
0x14ad   :  { %v1571_v36 = vmul.f32 %v2561_v7, %v1569_v34 }
0x14af   :  { %1573 = vrot.lane.b32.xlu0 %v1571_v36, %s2608_s26 }
0x151a   :  { %v1673_v39 = vpop.permute.xlu1 %1672 }
0x151b   :  { %v1675_v40 = vadd.f32 %v1673_v39, %v1665_v37 }
0x151d   :  { %2562 = vtanh.f32 %v1675_v40 }
0x1521   :  { %v1574_v10 = vpop.permute.xlu0 %1573 }
0x1522   :  { %v1576_v43 = vadd.f32 %v1574_v10, %v1566_v41 }
0x1524   :  { %2564 = vtanh.f32 %v1576_v43 }
0x1527   :  { %v2563_v44 = vpop.eup %2562 }
0x1528   :  { %1678 = vrot.lane.b32.xlu1 %v2563_v44, %s2607_s25 }
0x152e   :  { %v2565_v45 = vpop.eup %2564 }
0x152f   :  { %1579 = vrot.lane.b32.xlu0 %v2565_v45, %s2607_s25 }
0x159a   :  { %v1679_v11 = vpop.permute.xlu1 %1678 }
0x159b   :  { %v1681_v12 = vmul.f32 %v2559_v30, %v1679_v11 }
0x159d   :  { %1683 = vrot.lane.b32.xlu0 %v1681_v12, %s2608_s26 }
0x15a1   :  { %v1580_v46 = vpop.permute.xlu0 %1579 }
0x15a2   :  { %v1582_v47 = vmul.f32 %v2561_v7, %v1580_v46 }
0x15a4   :  { %1687 = vrot.lane.b32.xlu1 %v1582_v47, %s2607_s25 }
0x160f   :  { %v1684_v48 = vpop.permute.xlu0 %1683 }
0x1616   :  { %v1688_v49 = vpop.permute.xlu1 %1687 }
0x1617   :  { %v1690_v50 = vsel %vm151_vm1, %v1684_v48, %v1688_v49 }
0x1618   :  { %2272 = vmatmul.mubr.msk.f32.vlgmr.msra.gmra.mrb[16].mxu0 %vm255_vm2, %v1690_v50 }
0x16eb   :  { %v1760_v51 = vpop.f32.mrb[16].mxu0 }
0x16ec   :  { %v1761_v53 = vadd.f32 %v2779_v52, %v1760_v51  ;;  %v2273_v54 = vpop.f32.mrb[17].mxu0  ;;  %v1788_v52 = vld [vmem:[%s3066_s6] sm:$0xff] }
0x16ed   :  { %v2430_v5 = vpack.c.bf16 %v1789_v3, %v1788_v52 }
0x16ee   :  { %2566 = vtanh.f32 %v1761_v53  ;;  %v1914_v56 = vmul.f32 -1.442695, %v1761_v53 }
0x16ef   :  { %2431 = vmatpush3.bf16.msra.mxu1 %v2430_v5 }
0x16f0   :  { %2568 = vpow2.f32 %v1914_v56  ;;  %2432 = vmatprep.subr.bf16.mxu1 %v2603_v1 }
0x16f3   :  { %2434 = vmatpush3.bf16.msra.mxu1 %v2433_v8 }
0x16f8   :  { %v2567_v55 = vpop.eup %2566 }
0x16f9   :  { %1773 = vrot.lane.b32.xlu0 %v2567_v55, %s2607_s25 }
0x16fa   :  { %v2569_v57 = vpop.eup %2568 }
0x16fb   :  { %v1767_v58 = vadd.f32 1.0, %v2569_v57 }
0x16fd   :  { %2570 = vrcp.f32 %v1767_v58 }
0x1707   :  { %v2571_v59 = vpop.eup %2570 }
0x1708   :  { %v1771_v62 = vmul.f32 %v2571_v59, %v1576_v43 }
0x176b   :  { %v1774_v60 = vpop.permute.xlu0 %1773 }
0x176c   :  { %v1776_v61 = vmul.f32 %v2571_v59, %v1774_v60 }
0x176e   :  { %1778 = vrot.lane.b32.xlu1 %v1776_v61, %s2608_s26 }
0x17e0   :  { %v1779_v63 = vpop.permute.xlu1 %1778 }
0x17e1   :  { %v1781_v0 = vadd.f32 %v1779_v63, %v1771_v62 }
0x17e3   :  { %2572 = vtanh.f32 %v1781_v0 }
0x17ed   :  { %v2573_v9 = vpop.eup %2572 }
0x17ee   :  { %1784 = vrot.lane.b32.xlu0 %v2573_v9, %s2607_s25 }
0x1860   :  { %v1785_v13 = vpop.permute.xlu0 %1784 }
0x1861   :  { %v1787_v14 = vmul.f32 %v2571_v59, %v1785_v13 }
0x1863   :  { %1800 = vrot.lane.b32.xlu1 %v1787_v14, %s2608_s26 }
0x18d5   :  { %v1801_v33 = vpop.permute.xlu1 %1800 }
0x18d6   :  { %2283 = vmatmul.mubr.msk.f32.vlgmr.msra.gmra.mrb[14].mxu1 %vm151_vm1, %v1801_v33 }
0x19a9   :  { %v1870_v15 = vpop.f32.mrb[14].mxu1 }
0x19aa   :  { %v1871_v16 = vadd.f32 %v1915_v35, %v1870_v15  ;;  %v2284_v17 = vpop.f32.mrb[15].mxu1 }
0x19ac   :  { %1875 = vst.msk [vmem:[%s3068_s8] sm:$0x3] %vm1874_vm3, %v1871_v16 }
0x19ad   :  { %1880 = vsyncpa [#allocation5], 1 }

</bundles_post_ra>
